<compile_context>
chip_gen: v6e
topology: v6e:2x2x1
jax: 0.10.0
libtpu: 0.0.40
codegen_flags: <defaults>
</compile_context>

<pallas_src>
import functools

import jax
import jax.numpy as jnp
from jax import lax
from jax.experimental import pallas as pl
from jax.experimental.pallas import tpu as pltpu

GROUPS = 32
EPS = 1e-6
_ONES_ROWS = 16   # sublane-aligned (bf16 tile = 16 rows) block of ones rows on v


def _query_vmem_capacity():
    """Physical VMEM per core (trace/build-time query, safe fallback)."""
    cap = 128 * 1024 * 1024
    try:
        info = pltpu.get_tpu_info()
        cap = int(getattr(info, "vmem_capacity_bytes", cap))
    except Exception:
        pass
    return cap


_VMEM_CAP = _query_vmem_capacity()
# Leave headroom for Mosaic internal scratch; don't bother asking for >100 MiB.
_VMEM_LIMIT = max(32 * 1024 * 1024,
                  min(_VMEM_CAP - 12 * 1024 * 1024, 100 * 1024 * 1024))


def _pick_query_tile(hw):
    # Prefer 512/256 to fill the 256-wide MXU on v6e/v7x; on small-VMEM parts
    # (v7x: 64 MiB) cap at 256 for large HW so (TQ, HW) f32 score temporaries
    # stay within budget.
    small_vmem = _VMEM_CAP < 96 * 1024 * 1024
    prefer = (256, 128) if (small_vmem and hw >= 4096) else (512, 256, 128)
    for cand in prefer:
        if hw % cand == 0:
            return cand
    return hw   # single-tile fallback (also covers HW < 128)


def _pick_precompute_chunk(hw):
    if hw <= 1024:
        return hw
    for cand in (512, 256, 128):
        if hw % cand == 0:
            return cand
    return hw


# --------------------------------------------------------------------------
# Kernel 1: GroupNorm (affine folded into weights) + stacked q/k/v projection
# --------------------------------------------------------------------------
def _precompute_kernel(x_ref, pool_ref, bcast_ref, w_ref, b_ref,
                       q_out, k_out, v_out, *, chunk):
    # x_ref: (C, HW) for the current batch element.
    C, HW = x_ref.shape
    n_chunks = HW // chunk

    # ---- GroupNorm statistics: single-pass, f32, chunked over columns ------
    def stats_body(i, carry):
        s, ss = carry
        start = pl.multiple_of(i * chunk, chunk)
        xc = x_ref[:, pl.ds(start, chunk)].astype(jnp.float32)
        return (s + jnp.sum(xc, axis=1, keepdims=True),
                ss + jnp.sum(xc * xc, axis=1, keepdims=True))

    zero = jnp.zeros((C, 1), jnp.float32)
    ch_sum, ch_sq = lax.fori_loop(0, n_chunks, stats_body, (zero, zero))

    # Pool per-channel sums to per-group means (pool pre-scaled by 1/(cpg*HW)),
    # then broadcast the group statistics back to per-channel rows via a tiny
    # 0/1 (C, G) matvec — no sublane reshapes, no (C, C) matrix.
    mean_g = jnp.dot(pool_ref[...], ch_sum, preferred_element_type=jnp.float32)
    msq_g = jnp.dot(pool_ref[...], ch_sq, preferred_element_type=jnp.float32)
    inv_g = lax.rsqrt((msq_g - mean_g * mean_g) + EPS)              # (G, 1)
    mean_c = jnp.dot(bcast_ref[...], mean_g,
                     preferred_element_type=jnp.float32)            # (C, 1)
    inv_c = jnp.dot(bcast_ref[...], inv_g,
                    preferred_element_type=jnp.float32)             # (C, 1)

    # Ones rows appended to v: the attention output matmul then also yields
    # the softmax denominators (deferred normalization).
    v_out[C:C + _ONES_ROWS, :] = jnp.ones((_ONES_ROWS, HW), jnp.bfloat16)

    # ---- normalize + project, chunked over HW columns -----------------------
    # gamma/beta and the C**-0.5 scale are folded into w_ref/b_ref, so the
    # only VPU work here is (x - mean) * inv; the (3C, chunk) f32 qkv slab is
    # the largest live temporary.
    @pl.loop(0, n_chunks)
    def _(i):
        start = pl.multiple_of(i * chunk, chunk)
        xc = x_ref[:, pl.ds(start, chunk)].astype(jnp.float32)
        h = ((xc - mean_c) * inv_c).astype(jnp.bfloat16)             # (C, chunk)
        qkv = jnp.dot(w_ref[...], h,
                      preferred_element_type=jnp.float32) + b_ref[...]
        q_out[:, pl.ds(start, chunk)] = qkv[0:C, :].astype(jnp.bfloat16)
        k_out[:, pl.ds(start, chunk)] = qkv[C:2 * C, :].astype(jnp.bfloat16)
        v_out[0:C, pl.ds(start, chunk)] = qkv[2 * C:3 * C, :].astype(jnp.bfloat16)


# --------------------------------------------------------------------------
# Kernel 2: tiled attention with deferred softmax normalization
# --------------------------------------------------------------------------
def _attn_kernel(x_ref, q_ref, k_ref, v_ref, o_ref):
    # x_ref/q_ref/o_ref: (C, TQ); k_ref: (C, HW); v_ref: (C+16, HW).
    C, _ = o_ref.shape

    # scores[i, j] = sum_c q[c, i] * k[c, j] — transposed contraction (TN),
    # no materialized q.T, MXU with bf16 operands / f32 accumulation.
    s = lax.dot_general(q_ref[...], k_ref[...], (((0,), (0,)), ((), ())),
                        preferred_element_type=jnp.float32)          # (TQ, HW)
    p = jnp.exp(s - jnp.max(s, axis=1, keepdims=True))               # unnormalized
    # [v; 1] @ p.T (NT): rows 0..C-1 = unnormalized attention output, rows C..
    # = the softmax row sums, already lane-oriented.
    a_aug = lax.dot_general(v_ref[...], p.astype(jnp.bfloat16),
                            (((1,), (1,)), ((), ())),
                            preferred_element_type=jnp.float32)      # (C+16, TQ)
    inv_l = pl.reciprocal(a_aug[C:C + 1, :], approx=True)            # (1, TQ) EUP
    o_ref[...] = (x_ref[...].astype(jnp.float32)
                  + a_aug[0:C, :] * inv_l).astype(o_ref.dtype)


@functools.partial(jax.jit, static_argnames=("tq",))
def nonlocal_block(x, gamma, beta, wq, bq, wk, bk, wv, bv, *, tq=None):
    """NonLocalBlock forward: x + attention(GroupNorm(x)), NCHW layout."""
    B, C, H, W = x.shape
    HW = H * W
    assert C % GROUPS == 0, "GroupNorm(32) requires channels % 32 == 0"

    if tq is None:
        tq = _pick_query_tile(HW)
    assert HW % tq == 0
    nq = HW // tq
    chunk = _pick_precompute_chunk(HW)
    assert HW % chunk == 0

    x_flat = x.reshape(B, C, HW)

    # Factored group pooling / broadcasting matrices (replaces the (C, C)
    # membership matrix: cuts VMEM / DMA to 2*C*GROUPS).
    cpg = C // GROUPS
    gid = jnp.arange(C, dtype=jnp.int32) // cpg
    grange = jnp.arange(GROUPS, dtype=jnp.int32)
    pool = (grange[:, None] == gid[None, :]).astype(jnp.float32) / float(cpg * HW)
    bcast = (gid[:, None] == grange[None, :]).astype(jnp.float32)

    # Stacked q/k/v projection with the C**-0.5 attention scale folded into
    # the q rows and the GroupNorm affine (gamma/beta) folded into W / b:
    #   W @ (h*gamma + beta) + b  ==  (W*gamma_cols) @ h + (W @ beta + b)
    scale = float(int(C)) ** (-0.5)
    w_stack = jnp.concatenate([wq * scale, wk, wv], axis=0)          # (3C, C) f32
    b_stack = jnp.concatenate([bq * scale, bk, bv], axis=0)          # (3C,)  f32
    b_fold = (w_stack @ beta + b_stack).reshape(3 * C, 1).astype(jnp.float32)
    w_fold = (w_stack * gamma[None, :]).astype(jnp.bfloat16)

    # ---- kernel 1: per-batch GroupNorm + QKV projection ---------------------
    def _const(shape):
        return pl.BlockSpec(shape, lambda b: (0, 0))

    pre_cost = pl.CostEstimate(
        flops=int(B * (2 * 3 * C * C * HW + 6 * C * HW)),
        transcendentals=int(B * GROUPS),
        bytes_accessed=int(B * (C * HW * 4 + (3 * C + _ONES_ROWS) * HW * 2)
                           + 3 * C * C * 2),
    )
    q_hbm, k_hbm, v_hbm = pl.pallas_call(
        functools.partial(_precompute_kernel, chunk=chunk),
        out_shape=(
            jax.ShapeDtypeStruct((B, C, HW), jnp.bfloat16),                # q
            jax.ShapeDtypeStruct((B, C, HW), jnp.bfloat16),                # k
            jax.ShapeDtypeStruct((B, C + _ONES_ROWS, HW), jnp.bfloat16),   # [v;1]
        ),
        grid_spec=pltpu.PrefetchScalarGridSpec(
            num_scalar_prefetch=0,
            grid=(B,),
            in_specs=[
                pl.BlockSpec((None, C, HW), lambda b: (b, 0, 0)),   # x
                _const((GROUPS, C)),                                # pool
                _const((C, GROUPS)),                                # bcast
                _const((3 * C, C)),                                 # folded W (bf16)
                _const((3 * C, 1)),                                 # folded b (f32)
            ],
            out_specs=[
                pl.BlockSpec((None, C, HW), lambda b: (b, 0, 0)),
                pl.BlockSpec((None, C, HW), lambda b: (b, 0, 0)),
                pl.BlockSpec((None, C + _ONES_ROWS, HW), lambda b: (b, 0, 0)),
            ],
        ),
        compiler_params=pltpu.CompilerParams(
            dimension_semantics=("parallel",),
            vmem_limit_bytes=_VMEM_LIMIT,
        ),
        cost_estimate=pre_cost,
    )(x_flat, pool, bcast, w_fold, b_fold)

    # ---- kernel 2: fully parallel tiled attention ----------------------------
    attn_cost = pl.CostEstimate(
        flops=int(B * 4 * C * HW * HW),
        transcendentals=int(B * HW * HW),
        bytes_accessed=int(B * (2 * C * HW * 4
                                + (2 * C + C + _ONES_ROWS) * HW * 2)),
    )
    out = pl.pallas_call(
        _attn_kernel,
        out_shape=jax.ShapeDtypeStruct((B, C, HW), x.dtype),
        grid_spec=pltpu.PrefetchScalarGridSpec(
            num_scalar_prefetch=0,
            grid=(B, nq),
            in_specs=[
                pl.BlockSpec((None, C, tq), lambda b, q: (b, 0, q)),   # x residual
                pl.BlockSpec((None, C, tq), lambda b, q: (b, 0, q)),   # q tile
                pl.BlockSpec((None, C, HW), lambda b, q: (b, 0, 0)),   # k
                pl.BlockSpec((None, C + _ONES_ROWS, HW),
                             lambda b, q: (b, 0, 0)),                  # [v; ones]
            ],
            out_specs=pl.BlockSpec((None, C, tq), lambda b, q: (b, 0, q)),
        ),
        compiler_params=pltpu.CompilerParams(
            # q/k/v are precomputed, so every (batch, query-tile) grid point is
            # independent -> both axes parallel (v7x's two TCs can split nq
            # even at B=1).
            dimension_semantics=("parallel", "parallel"),
            vmem_limit_bytes=_VMEM_LIMIT,
        ),
        cost_estimate=attn_cost,
    )(x_flat, q_hbm, k_hbm, v_hbm)

    return out.reshape(B, C, H, W)


def _reference(x, gamma, beta, wq, bq, wk, bk, wv, bv):
    # Pure-JAX f32 reference mirroring the PyTorch forward exactly.
    B, C, H, W = x.shape
    xr = x.reshape(B, GROUPS, (C // GROUPS) * H * W)
    mean = xr.mean(-1, keepdims=True)
    var = ((xr - mean) ** 2).mean(-1, keepdims=True)
    h = ((xr - mean) / jnp.sqrt(var + EPS)).reshape(B, C, H, W)
    h = h * gamma.reshape(1, C, 1, 1) + beta.reshape(1, C, 1, 1)
    hf = h.reshape(B, C, H * W)
    q = jnp.einsum("oc,bcn->bon", wq, hf) + bq.reshape(1, C, 1)
    k = jnp.einsum("oc,bcn->bon", wk, hf) + bk.reshape(1, C, 1)
    v = jnp.einsum("oc,bcn->bon", wv, hf) + bv.reshape(1, C, 1)
    attn = jnp.einsum("bci,bcj->bij", q, k) * (int(C) ** (-0.5))
    attn = jax.nn.softmax(attn, axis=2)
    a = jnp.einsum("bcj,bij->bci", v, attn)
    return x + a.reshape(B, C, H, W)


if __name__ == "__main__":
    # Small but representative: C divisible by 32, HW=256 -> two 128-wide
    # query tiles so the tiled-attention path (and the chunked precompute
    # loops) are exercised.
    B, C, H, W = 2, 64, 16, 16

    key = jax.random.PRNGKey(0)
    kx, kg, kb, kwq, kbq, kwk, kbk, kwv, kbv = jax.random.split(key, 9)

    x = jax.random.normal(kx, (B, C, H, W), dtype=jnp.float32)
    gamma = 1.0 + 0.1 * jax.random.normal(kg, (C,), dtype=jnp.float32)
    beta = 0.1 * jax.random.normal(kb, (C,), dtype=jnp.float32)

    bound = 1.0 / (C ** 0.5)
    wq = jax.random.uniform(kwq, (C, C), jnp.float32, -bound, bound)
    bq = jax.random.uniform(kbq, (C,), jnp.float32, -bound, bound)
    wk = jax.random.uniform(kwk, (C, C), jnp.float32, -bound, bound)
    bk = jax.random.uniform(kbk, (C,), jnp.float32, -bound, bound)
    wv = jax.random.uniform(kwv, (C, C), jnp.float32, -bound, bound)
    bv = jax.random.uniform(kbv, (C,), jnp.float32, -bound, bound)

    out = nonlocal_block(x, gamma, beta, wq, bq, wk, bk, wv, bv, tq=128)
    out = jax.block_until_ready(out)

    ref = jax.block_until_ready(_reference(x, gamma, beta, wq, bq, wk, bk, wv, bv))

    assert out.shape == (B, C, H, W), out.shape
    # bf16 MXU operands (f32 accumulation, f32 GroupNorm/softmax statistics)
    # give ~1e-3 deviation from the pure-f32 reference.
    max_err = float(jnp.max(jnp.abs(out - ref)))
    assert max_err < 2e-2, max_err

    print("KERNEL_OK")
</pallas_src>

<mosaic_0001>
module attributes {stable_mosaic.version = 11 : i64} {
  func.func @_attn_kernel(%arg0: i32, %arg1: i32, %arg2: memref<1x64x128xf32, #tpu.memory_space<vmem>>, %arg3: memref<1x64x128xbf16, #tpu.memory_space<vmem>>, %arg4: memref<1x64x256xbf16, #tpu.memory_space<vmem>>, %arg5: memref<1x80x256xbf16, #tpu.memory_space<vmem>>, %arg6: memref<1x64x128xf32, #tpu.memory_space<vmem>>) attributes {dimension_semantics = [#tpu.dimension_semantics<parallel>, #tpu.dimension_semantics<parallel>], iteration_bounds = array<i64: 2, 2>, scalar_prefetch = 0 : i64, scratch_operands = 0 : i64, tpu.core_type = #tpu.core_type<tc>, window_params = [{transform_indices = @transform_0, window_bounds = array<i64: 1, 64, 128>}, {transform_indices = @transform_1, window_bounds = array<i64: 1, 64, 128>}, {transform_indices = @transform_2, window_bounds = array<i64: 1, 64, 256>}, {transform_indices = @transform_3, window_bounds = array<i64: 1, 80, 256>}, {transform_indices = @transform_4, window_bounds = array<i64: 1, 64, 128>}]} {
    %c0 = arith.constant 0 : index
    %c0_0 = arith.constant 0 : index
    %c0_1 = arith.constant 0 : index
    %0 = vector.load %arg3[%c0, %c0_0, %c0_1] : memref<1x64x128xbf16, #tpu.memory_space<vmem>>, vector<1x64x128xbf16>
    %1 = vector.shape_cast %0 : vector<1x64x128xbf16> to vector<64x128xbf16>
    %c0_2 = arith.constant 0 : index
    %c0_3 = arith.constant 0 : index
    %c0_4 = arith.constant 0 : index
    %2 = vector.load %arg4[%c0_2, %c0_3, %c0_4] : memref<1x64x256xbf16, #tpu.memory_space<vmem>>, vector<1x64x256xbf16>
    %3 = vector.shape_cast %2 : vector<1x64x256xbf16> to vector<64x256xbf16>
    %cst = arith.constant dense<0.000000e+00> : vector<128x256xf32>
    %4 = tpu.matmul %1, %3, %cst {dimension_numbers = #tpu.dot_dimension_numbers<[0], [0], [1], [1], [0, 1, 1, 1], [], []>} : vector<64x128xbf16>, vector<64x256xbf16>, vector<128x256xf32> -> vector<128x256xf32>
    %cst_5 = arith.constant dense<0xFF800000> : vector<128xf32>
    %5 = vector.multi_reduction <maximumf>, %4, %cst_5 [1] : vector<128x256xf32> to vector<128xf32>
    %6 = vector.shape_cast %5 : vector<128xf32> to vector<128x1xf32>
    %7 = vector.broadcast %6 : vector<128x1xf32> to vector<128x256xf32>
    %8 = arith.subf %4, %7 : vector<128x256xf32>
    %9 = math.exp %8 : vector<128x256xf32>
    %c0_6 = arith.constant 0 : index
    %c0_7 = arith.constant 0 : index
    %c0_8 = arith.constant 0 : index
    %10 = vector.load %arg5[%c0_6, %c0_7, %c0_8] : memref<1x80x256xbf16, #tpu.memory_space<vmem>>, vector<1x80x256xbf16>
    %11 = vector.shape_cast %10 : vector<1x80x256xbf16> to vector<80x256xbf16>
    %12 = arith.truncf %9 : vector<128x256xf32> to vector<128x256xbf16>
    %cst_9 = arith.constant dense<0.000000e+00> : vector<80x128xf32>
    %13 = tpu.matmul %11, %12, %cst_9 {dimension_numbers = #tpu.dot_dimension_numbers<[1], [1], [0], [0], [0, 0, 1, 0], [], []>} : vector<80x256xbf16>, vector<128x256xbf16>, vector<80x128xf32> -> vector<80x128xf32>
    %14 = vector.extract_strided_slice %13 {offsets = [64, 0], sizes = [1, 128], strides = [1, 1]} : vector<80x128xf32> to vector<1x128xf32>
    %15 = tpu.reciprocal %14 {approx = true} : vector<1x128xf32> -> vector<1x128xf32>
    %c0_10 = arith.constant 0 : index
    %c0_11 = arith.constant 0 : index
    %c0_12 = arith.constant 0 : index
    %16 = vector.load %arg2[%c0_10, %c0_11, %c0_12] : memref<1x64x128xf32, #tpu.memory_space<vmem>>, vector<1x64x128xf32>
    %17 = vector.shape_cast %16 : vector<1x64x128xf32> to vector<64x128xf32>
    %18 = vector.extract_strided_slice %13 {offsets = [0, 0], sizes = [64, 128], strides = [1, 1]} : vector<80x128xf32> to vector<64x128xf32>
    %19 = vector.broadcast %15 : vector<1x128xf32> to vector<64x128xf32>
    %20 = arith.mulf %18, %19 : vector<64x128xf32>
    %21 = arith.addf %17, %20 : vector<64x128xf32>
    %c0_13 = arith.constant 0 : index
    %c0_14 = arith.constant 0 : index
    %c0_15 = arith.constant 0 : index
    %22 = vector.load %arg6[%c0_13, %c0_14, %c0_15] : memref<1x64x128xf32, #tpu.memory_space<vmem>>, vector<1x64x128xf32>
    %23 = vector.shape_cast %22 : vector<1x64x128xf32> to vector<64x128xf32>
    %24 = vector.shape_cast %21 : vector<64x128xf32> to vector<1x64x128xf32>
    tpu.vector_store %arg6[%c0_13, %c0_14, %c0_15], %24 {strides = array<i32>} : memref<1x64x128xf32, #tpu.memory_space<vmem>>, vector<1x64x128xf32>,
    return
  }
  func.func @transform_0(%arg0: i32, %arg1: i32) -> (i32, i32, i32) {
    %c0_i32 = arith.constant 0 : i32
    %c0_i32_0 = arith.constant 0 : i32
    return %arg0, %c0_i32, %arg1 : i32, i32, i32
  }
  func.func @transform_1(%arg0: i32, %arg1: i32) -> (i32, i32, i32) {
    %c0_i32 = arith.constant 0 : i32
    %c0_i32_0 = arith.constant 0 : i32
    return %arg0, %c0_i32, %arg1 : i32, i32, i32
  }
  func.func @transform_2(%arg0: i32, %arg1: i32) -> (i32, i32, i32) {
    %c0_i32 = arith.constant 0 : i32
    %c0_i32_0 = arith.constant 0 : i32
    %c0_i32_1 = arith.constant 0 : i32
    return %arg0, %c0_i32, %c0_i32_0 : i32, i32, i32
  }
  func.func @transform_3(%arg0: i32, %arg1: i32) -> (i32, i32, i32) {
    %c0_i32 = arith.constant 0 : i32
    %c0_i32_0 = arith.constant 0 : i32
    %c0_i32_1 = arith.constant 0 : i32
    return %arg0, %c0_i32, %c0_i32_0 : i32, i32, i32
  }
  func.func @transform_4(%arg0: i32, %arg1: i32) -> (i32, i32, i32) {
    %c0_i32 = arith.constant 0 : i32
    %c0_i32_0 = arith.constant 0 : i32
    return %arg0, %c0_i32, %arg1 : i32, i32, i32
  }
}

module attributes {stable_mosaic.version = 11 : i64} {
  func.func @_precompute_kernel(%arg0: i32, %arg1: memref<1x64x256xf32, #tpu.memory_space<vmem>>, %arg2: memref<32x64xf32, #tpu.memory_space<vmem>>, %arg3: memref<64x32xf32, #tpu.memory_space<vmem>>, %arg4: memref<192x64xbf16, #tpu.memory_space<vmem>>, %arg5: memref<192x1xf32, #tpu.memory_space<vmem>>, %arg6: memref<1x64x256xbf16, #tpu.memory_space<vmem>>, %arg7: memref<1x64x256xbf16, #tpu.memory_space<vmem>>, %arg8: memref<1x80x256xbf16, #tpu.memory_space<vmem>>) attributes {dimension_semantics = [#tpu.dimension_semantics<parallel>], iteration_bounds = array<i64: 2>, scalar_prefetch = 0 : i64, scratch_operands = 0 : i64, tpu.core_type = #tpu.core_type<tc>, window_params = [{transform_indices = @transform_0, window_bounds = array<i64: 1, 64, 256>}, {pipeline_mode = #tpu.pipeline_mode<synchronous>, transform_indices = @transform_1, window_bounds = array<i64: 32, 64>}, {pipeline_mode = #tpu.pipeline_mode<synchronous>, transform_indices = @transform_2, window_bounds = array<i64: 64, 32>}, {pipeline_mode = #tpu.pipeline_mode<synchronous>, transform_indices = @transform_3, window_bounds = array<i64: 192, 64>}, {pipeline_mode = #tpu.pipeline_mode<synchronous>, transform_indices = @transform_4, window_bounds = array<i64: 192, 1>}, {transform_indices = @transform_5, window_bounds = array<i64: 1, 64, 256>}, {transform_indices = @transform_6, window_bounds = array<i64: 1, 64, 256>}, {transform_indices = @transform_7, window_bounds = array<i64: 1, 80, 256>}]} {
    %cst = arith.constant 0.000000e+00 : f32
    %0 = vector.broadcast %cst : f32 to vector<64x1xf32>
    %c0_i32 = arith.constant 0 : i32
    %c256_i32 = arith.constant 256 : i32
    %1 = arith.muli %c0_i32, %c256_i32 : i32
    %2 = tpu.assume_multiple %1, 256 : i32
    %c0 = arith.constant 0 : index
    %c0_0 = arith.constant 0 : index
    %3 = arith.index_cast %2 : i32 to index
    %4 = vector.load %arg1[%c0, %c0_0, %3] : memref<1x64x256xf32, #tpu.memory_space<vmem>>, vector<1x64x256xf32>
    %5 = vector.shape_cast %4 : vector<1x64x256xf32> to vector<64x256xf32>
    %cst_1 = arith.constant dense<0.000000e+00> : vector<64xf32>
    %6 = vector.multi_reduction <add>, %5, %cst_1 [1] : vector<64x256xf32> to vector<64xf32>
    %7 = vector.shape_cast %6 : vector<64xf32> to vector<64x1xf32>
    %8 = arith.addf %0, %7 : vector<64x1xf32>
    %9 = arith.mulf %5, %5 : vector<64x256xf32>
    %cst_2 = arith.constant dense<0.000000e+00> : vector<64xf32>
    %10 = vector.multi_reduction <add>, %9, %cst_2 [1] : vector<64x256xf32> to vector<64xf32>
    %11 = vector.shape_cast %10 : vector<64xf32> to vector<64x1xf32>
    %12 = arith.addf %0, %11 : vector<64x1xf32>
    %c1_i32 = arith.constant 1 : i32
    %c0_3 = arith.constant 0 : index
    %c0_4 = arith.constant 0 : index
    %13 = vector.load %arg2[%c0_3, %c0_4] : memref<32x64xf32, #tpu.memory_space<vmem>>, vector<32x64xf32>
    %cst_5 = arith.constant dense<0.000000e+00> : vector<32x1xf32>
    %14 = tpu.matmul %13, %8, %cst_5 {dimension_numbers = #tpu.dot_dimension_numbers<[1], [0], [0], [1], [0, 0, 1, 1], [], []>} : vector<32x64xf32>, vector<64x1xf32>, vector<32x1xf32> -> vector<32x1xf32>
    %c0_6 = arith.constant 0 : index
    %c0_7 = arith.constant 0 : index
    %15 = vector.load %arg2[%c0_6, %c0_7] : memref<32x64xf32, #tpu.memory_space<vmem>>, vector<32x64xf32>
    %cst_8 = arith.constant dense<0.000000e+00> : vector<32x1xf32>
    %16 = tpu.matmul %15, %12, %cst_8 {dimension_numbers = #tpu.dot_dimension_numbers<[1], [0], [0], [1], [0, 0, 1, 1], [], []>} : vector<32x64xf32>, vector<64x1xf32>, vector<32x1xf32> -> vector<32x1xf32>
    %17 = arith.mulf %14, %14 : vector<32x1xf32>
    %18 = arith.subf %16, %17 : vector<32x1xf32>
    %cst_9 = arith.constant 9.99999997E-7 : f32
    %19 = vector.broadcast %cst_9 : f32 to vector<32x1xf32>
    %20 = arith.addf %18, %19 : vector<32x1xf32>
    %21 = math.rsqrt %20 : vector<32x1xf32>
    %c0_10 = arith.constant 0 : index
    %c0_11 = arith.constant 0 : index
    %22 = vector.load %arg3[%c0_10, %c0_11] : memref<64x32xf32, #tpu.memory_space<vmem>>, vector<64x32xf32>
    %cst_12 = arith.constant dense<0.000000e+00> : vector<64x1xf32>
    %23 = tpu.matmul %22, %14, %cst_12 {dimension_numbers = #tpu.dot_dimension_numbers<[1], [0], [0], [1], [0, 0, 1, 1], [], []>} : vector<64x32xf32>, vector<32x1xf32>, vector<64x1xf32> -> vector<64x1xf32>
    %c0_13 = arith.constant 0 : index
    %c0_14 = arith.constant 0 : index
    %24 = vector.load %arg3[%c0_13, %c0_14] : memref<64x32xf32, #tpu.memory_space<vmem>>, vector<64x32xf32>
    %cst_15 = arith.constant dense<0.000000e+00> : vector<64x1xf32>
    %25 = tpu.matmul %24, %21, %cst_15 {dimension_numbers = #tpu.dot_dimension_numbers<[1], [0], [0], [1], [0, 0, 1, 1], [], []>} : vector<64x32xf32>, vector<32x1xf32>, vector<64x1xf32> -> vector<64x1xf32>
    %cst_16 = arith.constant 1.000000e+00 : bf16
    %26 = vector.broadcast %cst_16 : bf16 to vector<16x256xbf16>
    %c0_17 = arith.constant 0 : index
    %c64 = arith.constant 64 : index
    %c0_18 = arith.constant 0 : index
    %27 = vector.load %arg8[%c0_17, %c64, %c0_18] : memref<1x80x256xbf16, #tpu.memory_space<vmem>>, vector<1x16x256xbf16>
    %28 = vector.shape_cast %27 : vector<1x16x256xbf16> to vector<16x256xbf16>
    %29 = vector.shape_cast %26 : vector<16x256xbf16> to vector<1x16x256xbf16>
    tpu.vector_store %arg8[%c0_17, %c64, %c0_18], %29 {strides = array<i32>} : memref<1x80x256xbf16, #tpu.memory_space<vmem>>, vector<1x16x256xbf16>,
    %c0_i32_19 = arith.constant 0 : i32
    %c1_i32_20 = arith.constant 1 : i32
    %30 = arith.muli %c0_i32_19, %c1_i32_20 : i32
    %c0_i32_21 = arith.constant 0 : i32
    %31 = arith.addi %c0_i32_21, %30 : i32
    %c256_i32_22 = arith.constant 256 : i32
    %32 = arith.muli %31, %c256_i32_22 : i32
    %33 = tpu.assume_multiple %32, 256 : i32
    %c0_23 = arith.constant 0 : index
    %c0_24 = arith.constant 0 : index
    %34 = arith.index_cast %33 : i32 to index
    %35 = vector.load %arg1[%c0_23, %c0_24, %34] : memref<1x64x256xf32, #tpu.memory_space<vmem>>, vector<1x64x256xf32>
    %36 = vector.shape_cast %35 : vector<1x64x256xf32> to vector<64x256xf32>
    %37 = vector.broadcast %23 : vector<64x1xf32> to vector<64x256xf32>
    %38 = arith.subf %36, %37 : vector<64x256xf32>
    %39 = vector.broadcast %25 : vector<64x1xf32> to vector<64x256xf32>
    %40 = arith.mulf %38, %39 : vector<64x256xf32>
    %41 = arith.truncf %40 : vector<64x256xf32> to vector<64x256xbf16>
    %c0_25 = arith.constant 0 : index
    %c0_26 = arith.constant 0 : index
    %42 = vector.load %arg4[%c0_25, %c0_26] : memref<192x64xbf16, #tpu.memory_space<vmem>>, vector<192x64xbf16>
    %cst_27 = arith.constant dense<0.000000e+00> : vector<192x256xf32>
    %43 = tpu.matmul %42, %41, %cst_27 {dimension_numbers = #tpu.dot_dimension_numbers<[1], [0], [0], [1], [0, 0, 1, 1], [], []>} : vector<192x64xbf16>, vector<64x256xbf16>, vector<192x256xf32> -> vector<192x256xf32>
    %c0_28 = arith.constant 0 : index
    %c0_29 = arith.constant 0 : index
    %44 = vector.load %arg5[%c0_28, %c0_29] : memref<192x1xf32, #tpu.memory_space<vmem>>, vector<192x1xf32>
    %45 = vector.broadcast %44 : vector<192x1xf32> to vector<192x256xf32>
    %46 = arith.addf %43, %45 : vector<192x256xf32>
    %47 = vector.extract_strided_slice %46 {offsets = [0, 0], sizes = [64, 256], strides = [1, 1]} : vector<192x256xf32> to vector<64x256xf32>
    %48 = arith.truncf %47 : vector<64x256xf32> to vector<64x256xbf16>
    %c0_30 = arith.constant 0 : index
    %c0_31 = arith.constant 0 : index
    %49 = arith.index_cast %33 : i32 to index
    %50 = vector.load %arg6[%c0_30, %c0_31, %49] : memref<1x64x256xbf16, #tpu.memory_space<vmem>>, vector<1x64x256xbf16>
    %51 = vector.shape_cast %50 : vector<1x64x256xbf16> to vector<64x256xbf16>
    %52 = vector.shape_cast %48 : vector<64x256xbf16> to vector<1x64x256xbf16>
    tpu.vector_store %arg6[%c0_30, %c0_31, %49], %52 {strides = array<i32>} : memref<1x64x256xbf16, #tpu.memory_space<vmem>>, vector<1x64x256xbf16>,
    %53 = vector.extract_strided_slice %46 {offsets = [64, 0], sizes = [64, 256], strides = [1, 1]} : vector<192x256xf32> to vector<64x256xf32>
    %54 = arith.truncf %53 : vector<64x256xf32> to vector<64x256xbf16>
    %c0_32 = arith.constant 0 : index
    %c0_33 = arith.constant 0 : index
    %55 = arith.index_cast %33 : i32 to index
    %56 = vector.load %arg7[%c0_32, %c0_33, %55] : memref<1x64x256xbf16, #tpu.memory_space<vmem>>, vector<1x64x256xbf16>
    %57 = vector.shape_cast %56 : vector<1x64x256xbf16> to vector<64x256xbf16>
    %58 = vector.shape_cast %54 : vector<64x256xbf16> to vector<1x64x256xbf16>
    tpu.vector_store %arg7[%c0_32, %c0_33, %55], %58 {strides = array<i32>} : memref<1x64x256xbf16, #tpu.memory_space<vmem>>, vector<1x64x256xbf16>,
    %59 = vector.extract_strided_slice %46 {offsets = [128, 0], sizes = [64, 256], strides = [1, 1]} : vector<192x256xf32> to vector<64x256xf32>
    %60 = arith.truncf %59 : vector<64x256xf32> to vector<64x256xbf16>
    %c0_34 = arith.constant 0 : index
    %c0_35 = arith.constant 0 : index
    %61 = arith.index_cast %33 : i32 to index
    %62 = vector.load %arg8[%c0_34, %c0_35, %61] : memref<1x80x256xbf16, #tpu.memory_space<vmem>>, vector<1x64x256xbf16>
    %63 = vector.shape_cast %62 : vector<1x64x256xbf16> to vector<64x256xbf16>
    %64 = vector.shape_cast %60 : vector<64x256xbf16> to vector<1x64x256xbf16>
    tpu.vector_store %arg8[%c0_34, %c0_35, %61], %64 {strides = array<i32>} : memref<1x80x256xbf16, #tpu.memory_space<vmem>>, vector<1x64x256xbf16>,
    %c1_i32_36 = arith.constant 1 : i32
    return
  }
  func.func @transform_0(%arg0: i32) -> (i32, i32, i32) {
    %c0_i32 = arith.constant 0 : i32
    %c0_i32_0 = arith.constant 0 : i32
    %c0_i32_1 = arith.constant 0 : i32
    return %arg0, %c0_i32, %c0_i32_0 : i32, i32, i32
  }
  func.func @transform_1(%arg0: i32) -> (i32, i32) {
    %c0_i32 = arith.constant 0 : i32
    %c0_i32_0 = arith.constant 0 : i32
    %c0_i32_1 = arith.constant 0 : i32
    return %c0_i32, %c0_i32_0 : i32, i32
  }
  func.func @transform_2(%arg0: i32) -> (i32, i32) {
    %c0_i32 = arith.constant 0 : i32
    %c0_i32_0 = arith.constant 0 : i32
    %c0_i32_1 = arith.constant 0 : i32
    return %c0_i32, %c0_i32_0 : i32, i32
  }
  func.func @transform_3(%arg0: i32) -> (i32, i32) {
    %c0_i32 = arith.constant 0 : i32
    %c0_i32_0 = arith.constant 0 : i32
    %c0_i32_1 = arith.constant 0 : i32
    return %c0_i32, %c0_i32_0 : i32, i32
  }
  func.func @transform_4(%arg0: i32) -> (i32, i32) {
    %c0_i32 = arith.constant 0 : i32
    %c0_i32_0 = arith.constant 0 : i32
    %c0_i32_1 = arith.constant 0 : i32
    return %c0_i32, %c0_i32_0 : i32, i32
  }
  func.func @transform_5(%arg0: i32) -> (i32, i32, i32) {
    %c0_i32 = arith.constant 0 : i32
    %c0_i32_0 = arith.constant 0 : i32
    %c0_i32_1 = arith.constant 0 : i32
    return %arg0, %c0_i32, %c0_i32_0 : i32, i32, i32
  }
  func.func @transform_6(%arg0: i32) -> (i32, i32, i32) {
    %c0_i32 = arith.constant 0 : i32
    %c0_i32_0 = arith.constant 0 : i32
    %c0_i32_1 = arith.constant 0 : i32
    return %arg0, %c0_i32, %c0_i32_0 : i32, i32, i32
  }
  func.func @transform_7(%arg0: i32) -> (i32, i32, i32) {
    %c0_i32 = arith.constant 0 : i32
    %c0_i32_0 = arith.constant 0 : i32
    %c0_i32_1 = arith.constant 0 : i32
    return %arg0, %c0_i32, %c0_i32_0 : i32, i32, i32
  }
}

</mosaic_0001>

<bundles_post_ra>
// kernel: nonlocal_block.3
= control target key start
LH: loop header
LB: loop body
LE: loop exit
PB: predicated region body
PF: predicated region fallthrough
CT: control target
= control target key end

     0   :  { %s1466_s15 = smov 0   ;;  %s1468_s16 = smov 0   ;;  %s1704_s0 = inlined_call_operand.vmem [shape: f32[2,64,256], index: 0, kind: input, shape index: {}]   ;;  %s1705_s1 = inlined_call_operand.vmem [shape: bf16[2,64,256], index: 1, kind: input, shape index: {}]   ;;  %s1706_s2 = inlined_call_operand.vmem [shape: bf16[2,64,256], index: 2, kind: input, shape index: {}]   ;;  %s1707_s3 = inlined_call_operand.vmem [shape: bf16[2,80,256], index: 3, kind: input, shape index: {}]   ;;  %s1708_s4 = inlined_call_operand.vmem [shape: f32[2,64,256], index: 4, kind: output, shape index: {}]  }
   0x1   :  { %s1470_s17 = smov 0   ;;  %s1472_s18 = smov 0  }
   0x2   :  { %s1474_s19 = smov 0   ;;  %s1476_s20 = smov 0  }
   0x3   :  { %s1478_s21 = smov 0  }
   0x4 LB: > { %s23_s22 = sadd.s32 1, %s1430_s19  ;;  %s26_s23 = sadd.s32 1, %s1434_s20  ;;  %s1438_s21 = sphi %s1478_s21, %s14_s21   ;;  %s1434_s20 = sphi %s1476_s20, %s1716_s20   ;;  %s1430_s19 = sphi %s1474_s19, %s1715_s19   ;;  %s1426_s18 = sphi %s1472_s18, %s1714_s18   ;;  %s1422_s17 = sphi %s1470_s17, %s1713_s17   ;;  %s1418_s16 = sphi %s1468_s16, %s1712_s16   ;;  %s1414_s15 = sphi %s1466_s15, %s1711_s15  }
   0x5   : > { %p24_p0 = scmp.ge.s32.totalorder %s23_s22, 2  ;;  %s1160_s24 = sadd.s32 4294967295, %s1438_s21  }
   0x6   : > { %p42_p1 = scmp.ne.s32.totalorder %s1418_s16, %s1414_s15  ;;  %p43_p2 = scmp.eq.s32.totalorder %s1438_s21, 0 }
   0x7   : > { %s1718_s22 = smov (%p24_p0, %s23_s22), 0  ;;  %s1720_s23 = smov (!%p24_p0, %s26_s23), %s1434_s20 }
   0x8   : > { %p28_p3 = scmp.ge.s32.totalorder %s1720_s23, 2  ;;  %p154_p4 = scmp.eq.s32.totalorder %s1160_s24, 3 }
   0x9   : > { %s31_s25 = ssub.s32 %s1430_s19, %s1718_s22  ;;  %p1512_p5 = por %p43_p2, %p42_p1 }
   0xa   : > { %s1722_s23 = smov (%p28_p3, %s1720_s23), 0  ;;  %p1518_p6 = por %p154_p4, %p42_p1 }
   0xb   : > { %s30_s28 = ssub.s32 %s1434_s20, %s1722_s23  ;;  %s35_s30 = sadd.s32 1, %s1418_s16 }
   0xc   : > { %s32_s29 = sor.u32 %s31_s25, %s30_s28  ;;  %p1163_p8 = scmp.ge.s32.totalorder %s1438_s21, 4 }
   0xd   : > { %p33_p7 = scmp.eq.s32.totalorder %s32_s29, 0 }
   0xe   : > { %176 = sbr.rel (%p1163_p8) target bundleno = 40 (0x28), region = 16 }
   0xf   : > { %s1526_s5 = scalar_select %p33_p7, %s1418_s16, %s35_s30  }
  0x13   : > { %179 = sbr.rel (!%p1512_p5) target bundleno = 29 (0x1d), region = 20  ;;  %s181_s6 = sand.u32 (%p1512_p5), 1, %s1418_s16  }
  0x14   : > { %s1165_s7 = sshll.u32 (%p1512_p5), %s1434_s20, 4  ;;  %s1164_s8 = sshll.u32 (%p1512_p5), %s181_s6, 6 }
  0x15   : > { %s185_s9 = sadd.s32 (%p1512_p5), %s1430_s19, %s1165_s7  ;;  %s183_s14 = scalar_lea.vmem (%p1512_p5), [#allocation2], %s1164_s8 }
  0x16   : > { %s1166_s10 = sshll.u32 (%p1512_p5), %s185_s9, 3 }
  0x17   : > { %s187_s13 = scalar_lea.vmem (%p1512_p5), %s1704_s0, %s1166_s10 }
  0x18   : > { %v230_v0 = vld [vmem:[%s187_s13] sm:$0xff]  ;;  %v232_v1 = vld [vmem:[%s187_s13 + $0x10] sm:$0xff] }
  0x19   : > { %v234_v2 = vld [vmem:[%s187_s13 + $0x20] sm:$0xff]  ;;  %231 = vst [vmem:[%s183_s14] sm:$0xff] %v230_v0  ;;  %233 = vst [vmem:[%s183_s14 + $0x8] sm:$0xff] %v232_v1  ;;  %v236_v3 = vld [vmem:[%s187_s13 + $0x30] sm:$0xff] }
  0x1a   : > { %235 = vst [vmem:[%s183_s14 + $0x10] sm:$0xff] %v234_v2  ;;  %v238_v4 = vld [vmem:[%s187_s13 + $0x40] sm:$0xff]  ;;  %v240_v5 = vld [vmem:[%s187_s13 + $0x50] sm:$0xff]  ;;  %237 = vst [vmem:[%s183_s14 + $0x18] sm:$0xff] %v236_v3 }
  0x1b   : > { %239 = vst [vmem:[%s183_s14 + $0x20] sm:$0xff] %v238_v4  ;;  %241 = vst [vmem:[%s183_s14 + $0x28] sm:$0xff] %v240_v5  ;;  %v242_v6 = vld [vmem:[%s187_s13 + $0x60] sm:$0xff]  ;;  %v244_v7 = vld [vmem:[%s187_s13 + $0x70] sm:$0xff] }
  0x1c   : > { %243 = vst [vmem:[%s183_s14 + $0x30] sm:$0xff] %v242_v6  ;;  %245 = vst [vmem:[%s183_s14 + $0x38] sm:$0xff] %v244_v7 }
  0x1d PF: > { %251 = sbr.rel (!%p1512_p5) target bundleno = 40 (0x28), region = 58  ;;  %s253_s24 = sand.u32 (%p1512_p5), 1, %s1418_s16  }
  0x1e   : > { %s1168_s25 = sshll.u32 (%p1512_p5), %s1434_s20, 4  ;;  %s1167_s28 = sshll.u32 (%p1512_p5), %s253_s24, 5 }
  0x1f   : > { %s257_s29 = sadd.s32 (%p1512_p5), %s1430_s19, %s1168_s25  ;;  %s255_s9 = scalar_lea.vmem (%p1512_p5), [#allocation3], %s1167_s28 }
  0x20   : > { %s1169_s30 = sshll.u32 (%p1512_p5), %s257_s29, 2 }
  0x21   : > { %s259_s8 = scalar_lea.vmem (%p1512_p5), %s1705_s1, %s1169_s30 }
  0x22   : > { %v276_v8 = vld [vmem:[%s259_s8] sm:$0xf]  ;;  %v278_v9 = vld [vmem:[%s259_s8 + $0x8] sm:$0xf]  ;;  %v280_v10 = vld [vmem:[%s259_s8 + $0x10] sm:$0xf] }
  0x23   : > { %277 = vst [vmem:[%s255_s9] sm:$0xf] %v276_v8  ;;  %279 = vst [vmem:[%s255_s9 + $0x4] sm:$0xf] %v278_v9  ;;  %v282_v11 = vld [vmem:[%s259_s8 + $0x18] sm:$0xf] }
  0x24   : > { %281 = vst [vmem:[%s255_s9 + $0x8] sm:$0xf] %v280_v10  ;;  %v284_v12 = vld [vmem:[%s259_s8 + $0x20] sm:$0xf]  ;;  %v286_v13 = vld [vmem:[%s259_s8 + $0x28] sm:$0xf] }
  0x25   : > { %283 = vst [vmem:[%s255_s9 + $0xc] sm:$0xf] %v282_v11  ;;  %285 = vst [vmem:[%s255_s9 + $0x10] sm:$0xf] %v284_v12  ;;  %v288_v14 = vld [vmem:[%s259_s8 + $0x30] sm:$0xf] }
  0x26   : > { %287 = vst [vmem:[%s255_s9 + $0x14] sm:$0xf] %v286_v13  ;;  %v290_v15 = vld [vmem:[%s259_s8 + $0x38] sm:$0xf]  ;;  %289 = vst [vmem:[%s255_s9 + $0x18] sm:$0xf] %v288_v14 }
  0x27   : > { %291 = vst [vmem:[%s255_s9 + $0x1c] sm:$0xf] %v290_v15 }
  0x28 PF: > { %p1170_p9 = scmp.ge.s32.totalorder %s1438_s21, 1  ;;  %p346_p10 = scmp.lt.s32.totalorder %s1438_s21, 5 }
  0x2a   : > { %p347_p11 = pnand %p1170_p9, %p346_p10 }
  0x2b   : > { %s353_s26 = sand.u32 (!%p347_p11), 1, %s1414_s15   ;;  %p398_p12 = scmp.lt.s32.totalorder (!%p347_p11), %s1426_s18, 1 }
  0x2c   : > { %350 = sbr.rel (%p347_p11) target bundleno = 878 (0x36e), region = 107  ;;  %s1172_s10 = sshll.u32 (!%p347_p11), %s353_s26, 5 }
  0x2d   : > { %s362_s11 = scalar_lea.vmem (!%p347_p11), [#allocation3], %s1172_s10  ;;  %s1171_s7 = sshll.u32 (!%p347_p11), %s353_s26, 6 }
  0x2e   : > { %s355_s8 = scalar_lea.vmem (!%p347_p11), [#allocation2], %s1171_s7  ;;  %s397_s15 = scalar_lea.vmem (!%p347_p11), [#allocation4], %s1171_s7 }
  0x31   : > { %v1440_v16 = vmov 0   ;;  %v1287_v17 = vld [vmem:[%s362_s11] sm:$0xff]   ;;  %s399_s12 = scalar_select %p398_p12, %s1426_s18, 1  ;;  %v1288_v18 = vld [vmem:[%s362_s11 + $0x8] sm:$0xff]   ;;  %v1289_v21 = vld [vmem:[%s362_s11 + $0x10] sm:$0xff]   ;;  %vm505_vm0 = vcmask 523264  }
  0x32   : > { %562 = vmatprep.mubr.bf16.mxu0 %v1440_v16  ;;  %449 = vxpose.xlu0.c.b16.start [1/4] (short) %v1287_v17, 128  ;;  %v1290_v24 = vld [vmem:[%s362_s11 + $0x18] sm:$0xff]   ;;  %s1208_s9 = sshll.u32 (%p1518_p6), %s1426_s18, 4 }
  0x33   : > { %s1212_s13 = sshll.u32 %s399_s12, 6  ;;  %s1229_s28 = smul.u32 80, %s399_s12 }
  0x34   : > { %s402_s25 = scalar_lea.vmem %s1706_s2, %s1212_s13  ;;  %s980_s26 = sadd.s32 (%p1518_p6), %s1422_s17, %s1208_s9 }
  0x35   : > { %v1291_v19 = vld [vmem:[%s402_s25 + $0x34] ss:$8 sps:$4 sm:$0xff]   ;;  %v1293_v20 = vld [vmem:[%s402_s25 + $0x30] ss:$8 sps:$4 sm:$0xff]   ;;  %v1294_v22 = vld [vmem:[%s402_s25 + $0x24] ss:$8 sps:$4 sm:$0xff]   ;;  %s1558_s6 = scalar_lea.vmem %s1707_s3, %s1229_s28 }
  0x36   : > { %450 = vxpose.xlu0.c.b16.cont [2/4] (short) %v1288_v18, 128  ;;  %538 = vmatprep.subr.bf16.mxu0 %v1291_v19  ;;  %v1296_v23 = vld [vmem:[%s402_s25 + $0x20] ss:$8 sps:$4 sm:$0xff]   ;;  %v1297_v25 = vld [vmem:[%s402_s25 + $0x14] ss:$8 sps:$4 sm:$0xff]   ;;  %v1299_v26 = vld [vmem:[%s402_s25 + $0x10] ss:$8 sps:$4 sm:$0xff]  }
  0x37   : > { %539 = vmatpush1.bf16.msra.mxu0 %v1293_v20  ;;  %v1300_v27 = vld [vmem:[%s402_s25 + $0x4] ss:$8 sps:$4 sm:$0xff]   ;;  %v1302_v28 = vld [vmem:[%s402_s25] ss:$8 sps:$4 sm:$0xff]   ;;  %s1209_s10 = sshll.u32 (%p1518_p6), %s980_s26, 3 }
  0x38   : > { %540 = vmatprep.subr.bf16.mxu0 %v1294_v22  ;;  %v1317_v22 = vld [vmem:[%s1558_s6 + $0x4] ss:$8 sps:$4 sm:$0xff]   ;;  %s982_s13 = scalar_lea.vmem (%p1518_p6), %s1708_s4, %s1209_s10 }
  0x3a   : > { %451 = vxpose.xlu0.c.b16.cont [3/4] (short) %v1289_v21, 128  ;;  %v1305_v21 = vld [vmem:[%s1558_s6 + $0x14] ss:$8 sps:$4 sm:$0xff]  }
  0x3b   : > { %541 = vmatpush1.bf16.msra.mxu0 %v1296_v23  ;;  %903 = vmatprep.mubr.bf16.mxu1 %v1305_v21 }
  0x3c   : > { %542 = vmatprep.subr.bf16.mxu0 %v1297_v25 }
  0x3e   : > { %452 = vxpose.xlu0.c.b16.end [4/4] (short) %v1290_v24, 128 }
  0x3f   : > { %543 = vmatpush1.bf16.msra.mxu0 %v1299_v26 }
  0x40   : > { %544 = vmatprep.subr.bf16.mxu0 %v1300_v27 }
  0x43   : > { %545 = vmatpush1.bf16.msra.mxu0 %v1302_v28 }
  0x94   : > { %v457_v29 = vpop.trf.xlu0 }
  0x95   : > { %1189 = vmatmul.mubr.msk.bf16.vlgmr.msra.gmra.mxu0 %vm505_vm0, %v457_v29 }
  0x96   : > { %572 = vmatprep.mubr.bf16.mxu0 %v1440_v16 }
  0x98   : > { %v458_v30 = vpop.trf.xlu0 }
  0x9c   : > { %v459_v31 = vpop.trf.xlu0 }
  0x9d   : > { %1190 = vmatmul.mubr.msk.bf16.gmra.mxu0 %vm505_vm0, %v458_v30 }
  0x9e   : > { %582 = vmatprep.mubr.bf16.mxu0 %v1440_v16 }
  0xa0   : > { %v460_v32 = vpop.trf.xlu0 }
  0xa4   : > { %v461_v33 = vpop.trf.xlu0 }
  0xa5   : > { %1191 = vmatmul.mubr.msk.bf16.gmra.mxu0 %vm505_vm0, %v459_v31 }
  0xa6   : > { %592 = vmatprep.mubr.bf16.mxu0 %v1440_v16 }
  0xa8   : > { %v462_v34 = vpop.trf.xlu0 }
  0xac   : > { %v463_v35 = vpop.trf.xlu0 }
  0xad   : > { %1192 = vmatmul.mubr.msk.bf16.gmra.mxu0 %vm505_vm0, %v460_v32 }
  0xae   : > { %602 = vmatprep.mubr.bf16.mxu0 %v1440_v16 }
  0xb0   : > { %v464_v36 = vpop.trf.xlu0 }
  0xb5   : > { %1193 = vmatmul.mubr.msk.bf16.gmra.mxu0 %vm505_vm0, %v461_v33 }
  0xb6   : > { %612 = vmatprep.mubr.bf16.mxu0 %v1440_v16 }
  0xbd   : > { %1194 = vmatmul.mubr.msk.bf16.gmra.mxu0 %vm505_vm0, %v462_v34 }
  0xbe   : > { %622 = vmatprep.mubr.bf16.mxu0 %v1440_v16 }
  0xc5   : > { %1195 = vmatmul.mubr.msk.bf16.gmra.mxu0 %vm505_vm0, %v463_v35 }
  0xc6   : > { %632 = vmatprep.mubr.bf16.mxu0 %v1440_v16 }
  0xcd   : > { %1196 = vmatmul.mubr.msk.bf16.gmra.mxu0 %vm505_vm0, %v464_v36 }
  0xce   : > { %895 = vmatprep.mubr.bf16.mxu0 %v1317_v22 }
 0x155   : > { %v1568_v37 = vpop.f32.mrf.mxu0 }
 0x157   : > { %v1570_v38 = vpop.f32.mrf.mxu0 }
 0x158   : > { %v643_v20 = vmax.f32 %v1568_v37, %v1570_v38 }
 0x159   : > { %v1572_v39 = vpop.f32.mrf.mxu0 }
 0x15b   : > { %v1574_v40 = vpop.f32.mrf.mxu0 }
 0x15c   : > { %v646_v1 = vmax.f32 %v1572_v39, %v1574_v40 }
 0x15d   : > { %v1576_v41 = vpop.f32.mrf.mxu0 }
 0x15f   : > { %v1578_v42 = vpop.f32.mrf.mxu0 }
 0x160   : > { %v649_v19 = vmax.f32 %v1576_v41, %v1578_v42 }
 0x161   : > { %v1580_v43 = vpop.f32.mrf.mxu0 }
 0x163   : > { %v1582_v44 = vpop.f32.mrf.mxu0 }
 0x164   : > { %v652_v62 = vmax.f32 %v1580_v43, %v1582_v44 }
 0x165   : > { %v1584_v45 = vpop.f32.mrf.mxu0 }
 0x167   : > { %v1586_v46 = vpop.f32.mrf.mxu0 }
 0x168   : > { %v655_v17 = vmax.f32 %v1584_v45, %v1586_v46 }
 0x169   : > { %v1588_v47 = vpop.f32.mrf.mxu0 }
 0x16b   : > { %v1590_v48 = vpop.f32.mrf.mxu0 }
 0x16c   : > { %v658_v18 = vmax.f32 %v1588_v47, %v1590_v48 }
 0x16d   : > { %v1592_v49 = vpop.f32.mrf.mxu0 }
 0x16f   : > { %v1594_v50 = vpop.f32.mrf.mxu0 }
 0x170   : > { %v661_v15 = vmax.f32 %v1592_v49, %v1594_v50 }
 0x171   : > { %v1596_v51 = vpop.f32.mrf.mxu0 }
 0x173   : > { %v1598_v52 = vpop.f32.mrf.mxu0 }
 0x174   : > { %v664_v16 = vmax.f32 %v1596_v51, %v1598_v52 }
 0x175   : > { %v1600_v53 = vpop.f32.mrf.mxu0 }
 0x177   : > { %v1602_v54 = vpop.f32.mrf.mxu0 }
 0x178   : > { %v667_v13 = vmax.f32 %v1600_v53, %v1602_v54 }
 0x179   : > { %v1604_v55 = vpop.f32.mrf.mxu0 }
 0x17b   : > { %v1606_v56 = vpop.f32.mrf.mxu0 }
 0x17c   : > { %v670_v14 = vmax.f32 %v1604_v55, %v1606_v56 }
 0x17d   : > { %v1608_v57 = vpop.f32.mrf.mxu0 }
 0x17f   : > { %v1610_v58 = vpop.f32.mrf.mxu0 }
 0x180   : > { %v673_v59 = vmax.f32 %v1608_v57, %v1610_v58 }
 0x181   : > { %v1614_v60 = vpop.f32.mrf.mxu0 }
 0x182   : > { %674 = vmax.xlane.f32.xlu0 %v673_v59 }
 0x183   : > { %v1616_v61 = vpop.f32.mrf.mxu0 }
 0x184   : > { %v676_v12 = vmax.f32 %v1614_v60, %v1616_v61 }
 0x185   : > { %v624_v63 = vpop.f32.mrf.mxu0 }
 0x186   : > { %653 = vmax.xlane.f32.xlu0 %v652_v62 }
 0x187   : > { %v626_v0 = vpop.f32.mrf.mxu0 }
 0x188   : > { %v679_v10 = vmax.f32 %v624_v63, %v626_v0 }
 0x189   : > { %v628_v2 = vpop.f32.mrf.mxu0 }
 0x18a   : > { %647 = vmax.xlane.f32.xlu0 %v646_v1 }
 0x18b   : > { %v630_v3 = vpop.f32.mrf.mxu0 }
 0x18c   : > { %v682_v11 = vmax.f32 %v628_v2, %v630_v3 }
 0x18d   : > { %v634_v4 = vpop.f32.mrf.mxu0 }
 0x18f   : > { %v636_v5 = vpop.f32.mrf.mxu0 }
 0x190   : > { %v685_v6 = vmax.f32 %v634_v4, %v636_v5 }
 0x191   : > { %v638_v7 = vpop.f32.mrf.mxu0 }
 0x192   : > { %686 = vmax.xlane.f32.xlu1 %v685_v6 }
 0x193   : > { %v640_v8 = vpop.f32.mrf.mxu0 }
 0x194   : > { %v688_v9 = vmax.f32 %v638_v7, %v640_v8 }
 0x196   : > { %689 = vmax.xlane.f32.xlu1 %v688_v9 }
 0x19a   : > { %680 = vmax.xlane.f32.xlu1 %v679_v10 }
 0x19e   : > { %683 = vmax.xlane.f32.xlu1 %v682_v11 }
 0x1a2   : > { %677 = vmax.xlane.f32.xlu1 %v676_v12 }
 0x1a6   : > { %668 = vmax.xlane.f32.xlu1 %v667_v13 }
 0x1aa   : > { %671 = vmax.xlane.f32.xlu1 %v670_v14 }
 0x1ae   : > { %662 = vmax.xlane.f32.xlu1 %v661_v15 }
 0x1b2   : > { %665 = vmax.xlane.f32.xlu1 %v664_v16 }
 0x1b6   : > { %656 = vmax.xlane.f32.xlu1 %v655_v17 }
 0x1ba   : > { %659 = vmax.xlane.f32.xlu1 %v658_v18 }
 0x1be   : > { %650 = vmax.xlane.f32.xlu1 %v649_v19 }
 0x1c2   : > { %644 = vmax.xlane.f32.xlu1 %v643_v20 }
 0x20b   : > { %v675_v36 = vpop.xlane.xlu0 %674 }
 0x21b   : > { %v687_v23 = vpop.xlane.xlu1 %686 }
 0x21c   : > { %v719_v24 = vsub.f32 %v634_v4, %v687_v23  ;;  %v720_v25 = vsub.f32 %v636_v5, %v687_v23  ;;  %v712_v4 = vsub.f32 %v1610_v58, %v675_v36 }
 0x21e   : > { %v779_v26 = vmul.f32 1.442695, %v719_v24  ;;  %v781_v27 = vmul.f32 1.442695, %v720_v25  ;;  %v765_v10 = vmul.f32 1.442695, %v712_v4 }
 0x21f   : > { %v690_v28 = vpop.xlane.xlu1 %689 }
 0x220   : > { %v721_v29 = vsub.f32 %v638_v7, %v690_v28  ;;  %v722_v30 = vsub.f32 %v640_v8, %v690_v28  ;;  %1318 = vpow2.f32 %v779_v26 }
 0x221   : > { %1320 = vpow2.f32 %v781_v27 }
 0x222   : > { %v783_v31 = vmul.f32 1.442695, %v721_v29  ;;  %v785_v32 = vmul.f32 1.442695, %v722_v30 }
 0x223   : > { %v681_v33 = vpop.xlane.xlu1 %680 }
 0x224   : > { %1322 = vpow2.f32 %v783_v31  ;;  %v715_v34 = vsub.f32 %v624_v63, %v681_v33  ;;  %v716_v35 = vsub.f32 %v626_v0, %v681_v33  ;;  %v711_v0 = vsub.f32 %v1608_v57, %v675_v36 }
 0x225   : > { %1324 = vpow2.f32 %v785_v32 }
 0x226   : > { %v771_v59 = vmul.f32 1.442695, %v715_v34  ;;  %v773_v62 = vmul.f32 1.442695, %v716_v35  ;;  %v763_v16 = vmul.f32 1.442695, %v711_v0 }
 0x227   : > { %v684_v1 = vpop.xlane.xlu1 %683 }
 0x228   : > { %v717_v5 = vsub.f32 %v628_v2, %v684_v1  ;;  %v718_v6 = vsub.f32 %v630_v3, %v684_v1  ;;  %1326 = vpow2.f32 %v771_v59 }
 0x229   : > { %1328 = vpow2.f32 %v773_v62 }
 0x22a   : > { %v775_v7 = vmul.f32 1.442695, %v717_v5  ;;  %v777_v8 = vmul.f32 1.442695, %v718_v6 }
 0x22b   : > { %v678_v9 = vpop.xlane.xlu1 %677 }
 0x22c   : > { %1330 = vpow2.f32 %v775_v7  ;;  %v713_v11 = vsub.f32 %v1614_v60, %v678_v9  ;;  %v714_v63 = vsub.f32 %v1616_v61, %v678_v9  ;;  %v654_v7 = vpop.xlane.xlu0 %653 }
 0x22d   : > { %1332 = vpow2.f32 %v777_v8  ;;  %v1319_v13 = vpop.eup %1318  ;;  %v698_v0 = vsub.f32 %v1582_v44, %v654_v7 }
 0x22e   : > { %v769_v12 = vmul.f32 1.442695, %v714_v63  ;;  %v767_v14 = vmul.f32 1.442695, %v713_v11  ;;  %v1321_v2 = vpop.eup %1320  ;;  %1334 = vpow2.f32 %v765_v10 }
 0x22f   : > { %v669_v58 = vpop.xlane.xlu1 %668 }
 0x230   : > { %v708_v3 = vsub.f32 %v1602_v54, %v669_v58  ;;  %1336 = vpow2.f32 %v769_v12  ;;  %v707_v21 = vsub.f32 %v1600_v53, %v669_v58 }
 0x231   : > { %v1323_v15 = vpop.eup %1322  ;;  %1338 = vpow2.f32 %v767_v14 }
 0x232   : > { %v1325_v17 = vpop.eup %1324  ;;  %v811_v18 = vpack.c.bf16 %v1323_v15, %v1319_v13  ;;  %v757_v61 = vmul.f32 1.442695, %v708_v3  ;;  %1340 = vpow2.f32 %v763_v16  ;;  %v755_v28 = vmul.f32 1.442695, %v707_v21  ;;  %v648_v16 = vpop.xlane.xlu0 %647 }
 0x233   : > { %v672_v60 = vpop.xlane.xlu1 %671  ;;  %v812_v19 = vpack.c.bf16 %v1325_v17, %v1321_v2  ;;  %v737_v15 = vmul.f32 1.442695, %v698_v0 }
 0x234   : > { %v709_v57 = vsub.f32 %v1604_v55, %v672_v60  ;;  %v710_v20 = vsub.f32 %v1606_v56, %v672_v60  ;;  %1342 = vpow2.f32 %v757_v61  ;;  %v694_v61 = vsub.f32 %v1574_v40, %v648_v16 }
 0x235   : > { %863 = vmatprep.subr.bf16.mxu0 %v812_v19  ;;  %1213 = vmatprep.subr.bf16.mxu1 %v812_v19  ;;  %v1327_v54 = vpop.eup %1326 }
 0x236   : > { %v761_v22 = vmul.f32 1.442695, %v710_v20  ;;  %864 = vmatpush1.bf16.xpose.msra.mxu0 %v811_v18  ;;  %1221 = vmatpush1.bf16.xpose.msra.mxu1 %v811_v18  ;;  %v1329_v24 = vpop.eup %1328  ;;  %v759_v25 = vmul.f32 1.442695, %v709_v57 }
 0x237   : > { %v663_v23 = vpop.xlane.xlu1 %662 }
 0x238   : > { %v704_v26 = vsub.f32 %v1594_v50, %v663_v23  ;;  %1344 = vpow2.f32 %v761_v22  ;;  %v703_v50 = vsub.f32 %v1592_v49, %v663_v23  ;;  %v729_v23 = vmul.f32 1.442695, %v694_v61  ;;  %v936_v61 = vld [vmem:[%s355_s8] sm:$0xff] }
 0x239   : > { %v1331_v27 = vpop.eup %1330  ;;  %1346 = vpow2.f32 %v759_v25 }
 0x23a   : > { %v1333_v55 = vpop.eup %1332  ;;  %v809_v56 = vpack.c.bf16 %v1331_v27, %v1327_v54  ;;  %v749_v31 = vmul.f32 1.442695, %v704_v26  ;;  %1348 = vpow2.f32 %v755_v28  ;;  %v693_v26 = vsub.f32 %v1572_v39, %v648_v16 }
 0x23b   : > { %v666_v29 = vpop.xlane.xlu1 %665  ;;  %v810_v30 = vpack.c.bf16 %v1333_v55, %v1329_v24  ;;  %v1335_v33 = vpop.eup %1334  ;;  %v944_v16 = vlaneseq }
 0x23c   : > { %v705_v53 = vsub.f32 %v1596_v51, %v666_v29  ;;  %v706_v32 = vsub.f32 %v1598_v52, %v666_v29  ;;  %1350 = vpow2.f32 %v749_v31  ;;  %v747_v52 = vmul.f32 1.442695, %v703_v50 }
 0x23d   : > { %865 = vmatprep.subr.bf16.mxu0 %v810_v30  ;;  %1214 = vmatprep.subr.bf16.mxu1 %v810_v30  ;;  %v1337_v34 = vpop.eup %1336 }
 0x23e   : > { %v753_v35 = vmul.f32 1.442695, %v706_v32  ;;  %866 = vmatpush1.bf16.xpose.msra.mxu0 %v809_v56  ;;  %1222 = vmatpush1.bf16.xpose.msra.mxu1 %v809_v56  ;;  %v808_v59 = vpack.c.bf16 %v1337_v34, %v1335_v33  ;;  %v1339_v62 = vpop.eup %1338  ;;  %v751_v1 = vmul.f32 1.442695, %v705_v53  ;;  %v727_v56 = vmul.f32 1.442695, %v693_v26 }
 0x23f   : > { %v657_v36 = vpop.xlane.xlu1 %656  ;;  %v1341_v51 = vpop.eup %1340 }
 0x240   : > { %v700_v4 = vsub.f32 %v1586_v46, %v657_v36  ;;  %1352 = vpow2.f32 %v753_v35  ;;  %867 = vmatprep.subr.bf16.mxu0 %v808_v59  ;;  %1215 = vmatprep.subr.bf16.mxu1 %v808_v59  ;;  %v807_v6 = vpack.c.bf16 %v1339_v62, %v1341_v51  ;;  %v699_v63 = vsub.f32 %v1584_v45, %v657_v36  ;;  %v1303_v62 = vld [vmem:[%s1558_s6 + $0x10] ss:$8 sps:$4 sm:$0xff]   ;;  %v1308_v51 = vld [vmem:[%s1558_s6 + $0x20] ss:$8 sps:$4 sm:$0xff]  }
 0x241   : > { %1354 = vpow2.f32 %v751_v1  ;;  %v1343_v10 = vpop.eup %1342  ;;  %v1315_v1 = vld [vmem:[%s1558_s6] ss:$8 sps:$4 sm:$0xff]  }
 0x242   : > { %v741_v49 = vmul.f32 1.442695, %v700_v4  ;;  %1356 = vpow2.f32 %v747_v52  ;;  %v1306_v4 = vld [vmem:[%s1558_s6 + $0x24] ss:$8 sps:$4 sm:$0xff]   ;;  %v1309_v52 = vld [vmem:[%s1558_s6 + $0x34] ss:$8 sps:$4 sm:$0xff]  }
 0x243   : > { %v660_v5 = vpop.xlane.xlu1 %659 }
 0x244   : > { %v701_v8 = vsub.f32 %v1588_v47, %v660_v5  ;;  %v702_v9 = vsub.f32 %v1590_v48, %v660_v5  ;;  %1358 = vpow2.f32 %v741_v49  ;;  %v739_v47 = vmul.f32 1.442695, %v699_v63  ;;  %v1311_v5 = vld [vmem:[%s1558_s6 + $0x30] ss:$8 sps:$4 sm:$0xff]  }
 0x245   : > { %v1345_v11 = vpop.eup %1344 }
 0x246   : > { %v745_v46 = vmul.f32 1.442695, %v702_v9  ;;  %868 = vmatpush1.bf16.xpose.msra.mxu0 %v807_v6  ;;  %1223 = vmatpush1.bf16.xpose.msra.mxu1 %v807_v6  ;;  %v806_v13 = vpack.c.bf16 %v1345_v11, %v1343_v10  ;;  %v743_v14 = vmul.f32 1.442695, %v701_v8  ;;  %v1347_v2 = vpop.eup %1346  ;;  %v1312_v6 = vld [vmem:[%s1558_s6 + $0x44] ss:$8 sps:$4 sm:$0xff]  }
 0x247   : > { %v651_v12 = vpop.xlane.xlu1 %650  ;;  %v1349_v3 = vpop.eup %1348 }
 0x248   : > { %v696_v58 = vsub.f32 %v1578_v42, %v651_v12  ;;  %1360 = vpow2.f32 %v745_v46  ;;  %869 = vmatprep.subr.bf16.mxu0 %v806_v13  ;;  %1216 = vmatprep.subr.bf16.mxu1 %v806_v13  ;;  %v695_v17 = vsub.f32 %v1576_v41, %v651_v12  ;;  %v805_v44 = vpack.c.bf16 %v1347_v2, %v1349_v3 }
 0x249   : > { %1362 = vpow2.f32 %v743_v14  ;;  %v1351_v18 = vpop.eup %1350  ;;  %v697_v42 = vsub.f32 %v1580_v43, %v654_v7  ;;  %v1314_v7 = vld [vmem:[%s1558_s6 + $0x40] ss:$8 sps:$4 sm:$0xff]  }
 0x24a   : > { %v733_v48 = vmul.f32 1.442695, %v696_v58  ;;  %v731_v20 = vmul.f32 1.442695, %v695_v17 }
 0x24b   : > { %v645_v45 = vpop.xlane.xlu1 %644  ;;  %v735_v41 = vmul.f32 1.442695, %v697_v42 }
 0x24c   : > { %1364 = vpow2.f32 %v733_v48  ;;  %v692_v60 = vsub.f32 %v1570_v38, %v645_v45  ;;  %v691_v38 = vsub.f32 %v1568_v37, %v645_v45 }
 0x24d   : > { %v1353_v19 = vpop.eup %1352  ;;  %1366 = vpow2.f32 %v739_v47 }
 0x24e   : > { %870 = vmatpush1.bf16.xpose.msra.mxu0 %v805_v44  ;;  %1224 = vmatpush1.bf16.xpose.msra.mxu1 %v805_v44  ;;  %1368 = vpow2.f32 %v737_v15  ;;  %v804_v57 = vpack.c.bf16 %v1353_v19, %v1351_v18  ;;  %v1355_v21 = vpop.eup %1354  ;;  %v725_v22 = vmul.f32 1.442695, %v692_v60  ;;  %v723_v27 = vmul.f32 1.442695, %v691_v38 }
 0x24f   : > { %v1357_v54 = vpop.eup %1356  ;;  %1370 = vpow2.f32 %v731_v20  ;;  %v945_v18 = vshrl.u32 %v944_v16, 7  ;;  %v939_v20 = vld [vmem:[%s355_s8 + $0x18] sm:$0xff] }
 0x250   : > { %871 = vmatprep.subr.bf16.mxu0 %v804_v57  ;;  %1217 = vmatprep.subr.bf16.mxu1 %v804_v57  ;;  %v803_v24 = vpack.c.bf16 %v1355_v21, %v1357_v54  ;;  %1372 = vpow2.f32 %v725_v22  ;;  %v938_v57 = vld [vmem:[%s355_s8 + $0x10] sm:$0xff]  ;;  %v940_v21 = vld [vmem:[%s355_s8 + $0x20] sm:$0xff]  ;;  %v941_v22 = vld [vmem:[%s355_s8 + $0x28] sm:$0xff] }
 0x251   : > { %v1359_v43 = vpop.eup %1358  ;;  %1374 = vpow2.f32 %v735_v41  ;;  %v946_v60 = vsub.s32 0, %v945_v18  ;;  %v942_v41 = vld [vmem:[%s355_s8 + $0x30] sm:$0xff]  ;;  %v943_v54 = vld [vmem:[%s355_s8 + $0x38] sm:$0xff] }
 0x252   : > { %1376 = vpow2.f32 %v729_v23 }
 0x253   : > { %1378 = vpow2.f32 %v723_v27 }
 0x254   : > { %1380 = vpow2.f32 %v727_v56 }
 0x255   : > { %v1361_v25 = vpop.eup %1360 }
 0x256   : > { %872 = vmatpush1.bf16.xpose.msra.mxu0 %v803_v24  ;;  %1225 = vmatpush1.bf16.xpose.msra.mxu1 %v803_v24  ;;  %v802_v40 = vpack.c.bf16 %v1361_v25, %v1359_v43  ;;  %v1363_v55 = vpop.eup %1362  ;;  %v937_v25 = vld [vmem:[%s355_s8 + $0x8] sm:$0xff] }
 0x258   : > { %873 = vmatprep.subr.bf16.mxu0 %v802_v40  ;;  %1218 = vmatprep.subr.bf16.mxu1 %v802_v40 }
 0x259   : > { %v1365_v28 = vpop.eup %1364 }
 0x25a   : > { %v1367_v29 = vpop.eup %1366 }
 0x25b   : > { %v1369_v30 = vpop.eup %1368  ;;  %v801_v37 = vpack.c.bf16 %v1363_v55, %v1367_v29 }
 0x25c   : > { %v800_v31 = vpack.c.bf16 %v1369_v30, %v1365_v28  ;;  %v1371_v39 = vpop.eup %1370 }
 0x25d   : > { %v1373_v53 = vpop.eup %1372 }
 0x25e   : > { %874 = vmatpush1.bf16.xpose.msra.mxu0 %v801_v37  ;;  %1226 = vmatpush1.bf16.xpose.msra.mxu1 %v801_v37  ;;  %v1375_v32 = vpop.eup %1374 }
 0x25f   : > { %875 = vmatprep.subr.bf16.mxu0 %v800_v31  ;;  %1219 = vmatprep.subr.bf16.mxu1 %v800_v31  ;;  %v1377_v33 = vpop.eup %1376  ;;  %v799_v34 = vpack.c.bf16 %v1375_v32, %v1371_v39 }
 0x260   : > { %v798_v50 = vpack.c.bf16 %v1377_v33, %v1373_v53  ;;  %v1379_v35 = vpop.eup %1378 }
 0x261   : > { %v1381_v36 = vpop.eup %1380 }
 0x262   : > { %v797_v59 = vpack.c.bf16 %v1381_v36, %v1379_v35 }
 0x266   : > { %876 = vmatpush1.bf16.xpose.msra.mxu0 %v799_v34  ;;  %1227 = vmatpush1.bf16.xpose.msra.mxu1 %v799_v34 }
 0x267   : > { %877 = vmatprep.subr.bf16.mxu0 %v798_v50  ;;  %1220 = vmatprep.subr.bf16.mxu1 %v798_v50 }
 0x26e   : > { %878 = vmatpush1.bf16.xpose.msra.mxu0 %v797_v59  ;;  %1228 = vmatpush1.bf16.xpose.msra.mxu1 %v797_v59 }
 0x275   : > { %904 = vmatmul.mubr.bf16.vlgmr.msra.gmra.mxu1 %v1303_v62  ;;  %896 = vmatmul.mubr.bf16.vlgmr.msra.gmra.mxu0 %v1315_v1 }
 0x276   : > { %911 = vmatprep.mubr.bf16.mxu1 %v1306_v4 }
 0x27d   : > { %912 = vmatmul.mubr.bf16.gmra.mxu1 %v1308_v51 }
 0x27e   : > { %919 = vmatprep.mubr.bf16.mxu1 %v1309_v52 }
 0x285   : > { %920 = vmatmul.mubr.bf16.gmra.mxu1 %v1311_v5 }
 0x286   : > { %927 = vmatprep.mubr.bf16.mxu1 %v1312_v6 }
 0x28d   : > { %928 = vmatmul.mubr.bf16.gmra.mxu1 %v1314_v7 }
 0x335   : > { %v905_v49 = vpop.f32.mrf.mxu1  ;;  %v897_v8 = vpop.f32.mrf.mxu0 }
 0x337   : > { %v907_v9 = vpop.f32.mrf.mxu1  ;;  %v899_v10 = vpop.f32.mrf.mxu0 }
 0x339   : > { %v908_v11 = vpop.f32.mrf.mxu1  ;;  %v900_v63 = vpop.f32.mrf.mxu0 }
 0x33b   : > { %v910_v46 = vpop.f32.mrf.mxu1  ;;  %v902_v0 = vpop.f32.mrf.mxu0 }
 0x33d   : > { %v913_v12 = vpop.f32.mrf.mxu1 }
 0x33f   : > { %v915_v13 = vpop.f32.mrf.mxu1 }
 0x341   : > { %v916_v14 = vpop.f32.mrf.mxu1 }
 0x343   : > { %v918_v58 = vpop.f32.mrf.mxu1 }
 0x345   : > { %v921_v2 = vpop.f32.mrf.mxu1 }
 0x347   : > { %v923_v47 = vpop.f32.mrf.mxu1 }
 0x349   : > { %v924_v48 = vpop.f32.mrf.mxu1 }
 0x34b   : > { %v926_v3 = vpop.f32.mrf.mxu1 }
 0x34d   : > { %v929_v15 = vpop.f32.mrf.mxu1 }
 0x34e   : > { %1382 = vrcp.f32 %v929_v15 }
 0x34f   : > { %v931_v45 = vpop.f32.mrf.mxu1 }
 0x351   : > { %v932_v17 = vpop.f32.mrf.mxu1 }
 0x353   : > { %v933_v44 = vpop.f32.mrf.mxu1 }
 0x35b   : > { %v1383_v19 = vpop.eup %1382 }
 0x35c   : > { %v947_v42 = vrot.slane %v1383_v19, %v946_v60 }
 0x35e   : > { %v948_v23 = vmul.f32 %v947_v42, %v897_v8  ;;  %v950_v38 = vmul.f32 %v947_v42, %v905_v49  ;;  %v951_v24 = vmul.f32 %v947_v42, %v908_v11  ;;  %v952_v43 = vmul.f32 %v947_v42, %v913_v12 }
 0x35f   : > { %v953_v26 = vmul.f32 %v947_v42, %v916_v14  ;;  %v954_v40 = vmul.f32 %v947_v42, %v921_v2  ;;  %v955_v27 = vmul.f32 %v947_v42, %v924_v48  ;;  %v949_v55 = vmul.f32 %v947_v42, %v900_v63 }
 0x360   : > { %v956_v28 = vadd.f32 %v948_v23, %v936_v61  ;;  %v958_v56 = vadd.f32 %v950_v38, %v938_v57  ;;  %v959_v29 = vadd.f32 %v951_v24, %v939_v20  ;;  %v960_v30 = vadd.f32 %v952_v43, %v940_v21 }
 0x361   : > { %v961_v37 = vadd.f32 %v953_v26, %v941_v22  ;;  %v962_v31 = vadd.f32 %v954_v40, %v942_v41  ;;  %v963_v39 = vadd.f32 %v955_v27, %v943_v54  ;;  %v957_v53 = vadd.f32 %v949_v55, %v937_v25  ;;  %978 = sbr.rel (!%p1518_p6) target bundleno = 878 (0x36e), region = 119 }
 0x362   : > { %964 = vst [vmem:[%s397_s15] sm:$0xff] %v956_v28  ;;  %966 = vst [vmem:[%s397_s15 + $0x10] sm:$0xff] %v958_v56 }
 0x363   : > { %967 = vst [vmem:[%s397_s15 + $0x18] sm:$0xff] %v959_v29  ;;  %968 = vst [vmem:[%s397_s15 + $0x20] sm:$0xff] %v960_v30 }
 0x364   : > { %969 = vst [vmem:[%s397_s15 + $0x28] sm:$0xff] %v961_v37  ;;  %970 = vst [vmem:[%s397_s15 + $0x30] sm:$0xff] %v962_v31 }
 0x365   : > { %971 = vst [vmem:[%s397_s15 + $0x38] sm:$0xff] %v963_v39  ;;  %965 = vst [vmem:[%s397_s15 + $0x8] sm:$0xff] %v957_v53 }
 0x369   : > { %v1025_v32 = vld [vmem:[%s397_s15] sm:$0xff]  ;;  %v1029_v34 = vld [vmem:[%s397_s15 + $0x10] sm:$0xff] }
 0x36a   : > { %v1031_v50 = vld [vmem:[%s397_s15 + $0x18] sm:$0xff]  ;;  %v1033_v35 = vld [vmem:[%s397_s15 + $0x20] sm:$0xff]  ;;  %1026 = vst [vmem:[%s982_s13] sm:$0xff] %v1025_v32  ;;  %1030 = vst [vmem:[%s982_s13 + $0x20] sm:$0xff] %v1029_v34 }
 0x36b   : > { %v1035_v36 = vld [vmem:[%s397_s15 + $0x28] sm:$0xff]  ;;  %v1037_v59 = vld [vmem:[%s397_s15 + $0x30] sm:$0xff]  ;;  %1032 = vst [vmem:[%s982_s13 + $0x30] sm:$0xff] %v1031_v50  ;;  %1034 = vst [vmem:[%s982_s13 + $0x40] sm:$0xff] %v1033_v35 }
 0x36c   : > { %v1027_v33 = vld [vmem:[%s397_s15 + $0x8] sm:$0xff]  ;;  %v1039_v62 = vld [vmem:[%s397_s15 + $0x38] sm:$0xff]  ;;  %1036 = vst [vmem:[%s982_s13 + $0x50] sm:$0xff] %v1035_v36  ;;  %1038 = vst [vmem:[%s982_s13 + $0x60] sm:$0xff] %v1037_v59 }
 0x36d   : > { %1028 = vst [vmem:[%s982_s13 + $0x10] sm:$0xff] %v1027_v33  ;;  %1040 = vst [vmem:[%s982_s13 + $0x70] sm:$0xff] %v1039_v62 }
 0x36e PF: > { %s14_s21 = sadd.s32 1, %s1438_s21   ;;  %s1711_s15 = smov %s1418_s16 }
 0x36f   : > { %p11_p13 = scmp.ge.s32.totalorder %s14_s21, 6   ;;  %s1712_s16 = smov %s1526_s5 }
 0x370   : > { %s1713_s17 = smov %s1430_s19  ;;  %s1714_s18 = smov %s1434_s20 }
 0x371   : > { %s1715_s19 = smov %s1718_s22  ;;  %s1716_s20 = smov %s1722_s23 }
 0x372   :  { %13 = sbr.rel (!%p11_p13) target bundleno = 4 (0x4), region = 202 }

// kernel: nonlocal_block.2
= control target key start
LH: loop header
LB: loop body
LE: loop exit
PB: predicated region body
PF: predicated region fallthrough
CT: control target
= control target key end

     0   :  { %s2028_s24 = smov 0   ;;  %s2428_s0 = inlined_call_operand.vmem [shape: f32[2,64,256], index: 0, kind: input, shape index: {}]   ;;  %s2429_s1 = inlined_call_operand.vmem [shape: f32[32,64], index: 1, kind: input, shape index: {}]   ;;  %s2430_s2 = inlined_call_operand.vmem [shape: f32[64,32], index: 2, kind: input, shape index: {}]   ;;  %s2431_s3 = inlined_call_operand.vmem [shape: bf16[192,64], index: 3, kind: input, shape index: {}]   ;;  %s2432_s4 = inlined_call_operand.vmem [shape: f32[192,1], index: 4, kind: input, shape index: {}]   ;;  %s2433_s5 = inlined_call_operand.vmem [shape: bf16[2,64,256], index: 5, kind: output, shape index: {0}]   ;;  %s2434_s6 = inlined_call_operand.vmem [shape: bf16[2,64,256], index: 6, kind: output, shape index: {1}]   ;;  %s2435_s7 = inlined_call_operand.vmem [shape: bf16[2,80,256], index: 7, kind: output, shape index: {2}]  }
   0x1 LB: > { %s1692_s25 = sadd.s32 4294967295, %s1984_s24   ;;  %p1696_p0 = scmp.ge.s32.totalorder %s1984_s24, 1  ;;  %s1984_s24 = sphi %s2028_s24, %s18_s24  }
   0x2   : > { %p242_p1 = scmp.lt.s32.totalorder %s1984_s24, 3 }
   0x4   : > { %p243_p2 = pnand %p1696_p0, %p242_p1 }
   0x5   : > { %p284_p3 = scmp.lt.s32.totalorder (!%p243_p2), %s1692_s25, 1 }
   0x6   : > { %246 = sbr.rel (%p243_p2) target bundleno = 1011 (0x3f3), region = 40 }
   0xb   : > { %s2437_s25 = smov (!%p284_p3, %s1692_s25), 1  ;;  %v402_v48 = vld [vmem:[%s2429_s1] sm:$0xff]  ;;  %vm406_vm0 = vcmask 523264   ;;  %v403_v63 = vld [vmem:[%s2429_s1 + $0x8] sm:$0xff]  ;;  %vm613_vm1 = vcmask 261120  }
   0xc   : > { %s1778_s26 = sshll.u32 %s2437_s25, 7  ;;  %1869 = vmatprep.mubr.msk.f32.mxu0 %vm406_vm0, %v402_v48  ;;  %1891 = vmatprep.mubr.msk.f32.mxu1 %vm406_vm0, %v402_v48  ;;  %s1945_s19 = smul.u32 80, %s2437_s25 }
   0xd   : > { %s2042_s29 = scalar_lea.vmem %s2428_s0, %s1778_s26  ;;  %s1779_s23 = sshll.u32 %s2437_s25, 6 }
   0xe   : > { %v2045_v0 = vld [vmem:[%s2042_s29 + $0x70] sm:$0xff]  ;;  %v2048_v1 = vld [vmem:[%s2042_s29 + $0x78] sm:$0xff]  ;;  %v2059_v5 = vld [vmem:[%s2042_s29 + $0x60] sm:$0xff]  ;;  %s2354_s22 = scalar_lea.vmem %s2435_s7, %s1945_s19  ;;  %s2378_s28 = scalar_lea.vmem %s2433_s5, %s1779_s23 }
   0xf   : > { %v2051_v2 = vld [vmem:[%s2042_s29 + $0x50] sm:$0xff]  ;;  %v343_v3 = vadd.f32 %v2048_v1, %v2045_v0  ;;  %v2056_v4 = vld [vmem:[%s2042_s29 + $0x58] sm:$0xff]  ;;  %v2062_v6 = vld [vmem:[%s2042_s29 + $0x68] sm:$0xff]  ;;  %v366_v11 = vmul.f32 %v2059_v5, %v2059_v5  ;;  %v368_v13 = vmul.f32 %v2045_v0, %v2045_v0  ;;  %v369_v14 = vmul.f32 %v2048_v1, %v2048_v1  ;;  %s2383_s8 = scalar_lea.vmem %s2434_s6, %s1779_s23 }
  0x10   : > { %v337_v7 = vadd.f32 %v2056_v4, %v2051_v2  ;;  %v2067_v8 = vld [vmem:[%s2042_s29 + $0x40] sm:$0xff]  ;;  %v2070_v9 = vld [vmem:[%s2042_s29 + $0x48] sm:$0xff]  ;;  %v340_v10 = vadd.f32 %v2062_v6, %v2059_v5  ;;  %v367_v12 = vmul.f32 %v2062_v6, %v2062_v6  ;;  %v364_v16 = vmul.f32 %v2051_v2, %v2051_v2  ;;  %v2089_v20 = vld [vmem:[%s2042_s29 + $0x30] sm:$0xff] }
  0x11   : > { %344 = vadd.xlane.f32.xlu0 %v343_v3  ;;  %v334_v15 = vadd.f32 %v2070_v9, %v2067_v8  ;;  %v365_v17 = vmul.f32 %v2056_v4, %v2056_v4  ;;  %v391_v19 = vadd.f32 %v369_v14, %v368_v13  ;;  %v2092_v21 = vld [vmem:[%s2042_s29 + $0x38] sm:$0xff]  ;;  %v362_v23 = vmul.f32 %v2067_v8, %v2067_v8  ;;  %v2101_v26 = vld [vmem:[%s2042_s29 + $0x20] sm:$0xff]  ;;  %v2104_v27 = vld [vmem:[%s2042_s29 + $0x28] sm:$0xff] }
  0x12   : > { %338 = vadd.xlane.f32.xlu1 %v337_v7  ;;  %v388_v18 = vadd.f32 %v367_v12, %v366_v11  ;;  %v363_v24 = vmul.f32 %v2070_v9, %v2070_v9  ;;  %v331_v25 = vadd.f32 %v2092_v21, %v2089_v20  ;;  %v360_v29 = vmul.f32 %v2089_v20, %v2089_v20  ;;  %v2113_v32 = vld [vmem:[%s2042_s29 + $0x10] sm:$0xff]  ;;  %v2116_v33 = vld [vmem:[%s2042_s29 + $0x18] sm:$0xff]  ;;  %v2125_v38 = vld [vmem:[%s2042_s29] sm:$0xff] }
  0x13   : > { %v385_v22 = vadd.f32 %v365_v17, %v364_v16  ;;  %v361_v30 = vmul.f32 %v2092_v21, %v2092_v21  ;;  %v328_v31 = vadd.f32 %v2104_v27, %v2101_v26  ;;  %v358_v35 = vmul.f32 %v2101_v26, %v2101_v26  ;;  %v2128_v39 = vld [vmem:[%s2042_s29 + $0x8] sm:$0xff]  ;;  %v404_v3 = vld [vmem:[%s2429_s1 + $0x10] sm:$0xff]  ;;  %v405_v11 = vld [vmem:[%s2429_s1 + $0x18] sm:$0xff] }
  0x14   : > { %v382_v28 = vadd.f32 %v363_v24, %v362_v23  ;;  %v359_v36 = vmul.f32 %v2104_v27, %v2104_v27  ;;  %v325_v37 = vadd.f32 %v2116_v33, %v2113_v32  ;;  %v356_v41 = vmul.f32 %v2113_v32, %v2113_v32  ;;  %v605_v12 = vld [vmem:[%s2430_s2] sm:$0xff] }
  0x15   : > { %341 = vadd.xlane.f32.xlu0 %v340_v10  ;;  %v379_v34 = vadd.f32 %v361_v30, %v360_v29  ;;  %v357_v42 = vmul.f32 %v2116_v33, %v2116_v33  ;;  %v322_v43 = vadd.f32 %v2128_v39, %v2125_v38  ;;  %v354_v44 = vmul.f32 %v2125_v38, %v2125_v38  ;;  %v606_v30 = vld [vmem:[%s2430_s2 + $0x8] sm:$0xff] }
  0x16   : > { %335 = vadd.xlane.f32.xlu1 %v334_v15  ;;  %v376_v40 = vadd.f32 %v359_v36, %v358_v35  ;;  %v355_v45 = vmul.f32 %v2128_v39, %v2128_v39 }
  0x17   : > { %v373_v46 = vadd.f32 %v357_v42, %v356_v41  ;;  %v608_v42 = vld [vmem:[%s2430_s2 + $0x18] sm:$0xff] }
  0x18   : > { %v370_v47 = vadd.f32 %v355_v45, %v354_v44  ;;  %v610_v45 = vld [vmem:[%s2430_s2 + $0x28] sm:$0xff] }
  0x19   : > { %389 = vadd.xlane.f32.xlu0 %v388_v18 }
  0x1a   : > { %392 = vadd.xlane.f32.xlu1 %v391_v19 }
  0x1d   : > { %386 = vadd.xlane.f32.xlu0 %v385_v22 }
  0x1e   : > { %332 = vadd.xlane.f32.xlu1 %v331_v25 }
  0x21   : > { %383 = vadd.xlane.f32.xlu0 %v382_v28 }
  0x22   : > { %329 = vadd.xlane.f32.xlu1 %v328_v31 }
  0x25   : > { %380 = vadd.xlane.f32.xlu0 %v379_v34  ;;  %v607_v34 = vld [vmem:[%s2430_s2 + $0x10] sm:$0xff] }
  0x26   : > { %326 = vadd.xlane.f32.xlu1 %v325_v37 }
  0x29   : > { %377 = vadd.xlane.f32.xlu0 %v376_v40 }
  0x2a   : > { %323 = vadd.xlane.f32.xlu1 %v322_v43  ;;  %v609_v43 = vld [vmem:[%s2430_s2 + $0x20] sm:$0xff] }
  0x2d   : > { %374 = vadd.xlane.f32.xlu0 %v373_v46  ;;  %v611_v46 = vld [vmem:[%s2430_s2 + $0x30] sm:$0xff] }
  0x2e   : > { %371 = vadd.xlane.f32.xlu1 %v370_v47  ;;  %v612_v47 = vld [vmem:[%s2430_s2 + $0x38] sm:$0xff] }
  0x9a   : > { %v345_v49 = vpop.xlane.xlu0 %344 }
  0x9b   : > { %v339_v50 = vpop.xlane.xlu1 %338  ;;  %1853 = vmatprep.subr.mxu0 %v345_v49 }
  0x9c   : > { %1854 = vmatpush3.msra.mxu0 %v345_v49 }
  0x9e   : > { %v342_v51 = vpop.xlane.xlu0 %341 }
  0x9f   : > { %v336_v52 = vpop.xlane.xlu1 %335  ;;  %1855 = vmatprep.subr.mxu0 %v342_v51 }
  0xa0   : > { %1856 = vmatpush3.msra.mxu0 %v342_v51 }
  0xa1   : > { %1857 = vmatprep.subr.mxu0 %v339_v50 }
  0xa2   : > { %v390_v53 = vpop.xlane.xlu0 %389  ;;  %1858 = vmatpush3.msra.mxu0 %v339_v50 }
  0xa3   : > { %v393_v54 = vpop.xlane.xlu1 %392  ;;  %1859 = vmatprep.subr.mxu0 %v336_v52 }
  0xa4   : > { %1875 = vmatprep.subr.mxu1 %v393_v54  ;;  %1860 = vmatpush3.msra.mxu0 %v336_v52  ;;  %v1986_v52 = vmov 0  }
  0xa5   : > { %1876 = vmatpush3.msra.mxu1 %v393_v54  ;;  %1956 = vset.pattern.permute.xlu1 %v1986_v52 }
  0xa6   : > { %1877 = vmatprep.subr.mxu1 %v390_v53  ;;  %v387_v55 = vpop.xlane.xlu0 %386  ;;  %1957 = vset.pattern.permute.xlu0 %v1986_v52 }
  0xa7   : > { %1878 = vmatpush3.msra.mxu1 %v390_v53  ;;  %v333_v56 = vpop.xlane.xlu1 %332 }
  0xa8   : > { %1879 = vmatprep.subr.mxu1 %v387_v55  ;;  %1861 = vmatprep.subr.mxu0 %v333_v56 }
  0xa9   : > { %1880 = vmatpush3.msra.mxu1 %v387_v55  ;;  %1862 = vmatpush3.msra.mxu0 %v333_v56 }
  0xaa   : > { %v384_v57 = vpop.xlane.xlu0 %383 }
  0xab   : > { %v330_v58 = vpop.xlane.xlu1 %329  ;;  %1881 = vmatprep.subr.mxu1 %v384_v57 }
  0xac   : > { %1863 = vmatprep.subr.mxu0 %v330_v58  ;;  %1882 = vmatpush3.msra.mxu1 %v384_v57 }
  0xad   : > { %1864 = vmatpush3.msra.mxu0 %v330_v58 }
  0xae   : > { %v381_v59 = vpop.xlane.xlu0 %380 }
  0xaf   : > { %v327_v60 = vpop.xlane.xlu1 %326  ;;  %1883 = vmatprep.subr.mxu1 %v381_v59 }
  0xb0   : > { %1865 = vmatprep.subr.mxu0 %v327_v60  ;;  %1884 = vmatpush3.msra.mxu1 %v381_v59 }
  0xb1   : > { %1866 = vmatpush3.msra.mxu0 %v327_v60 }
  0xb2   : > { %v378_v61 = vpop.xlane.xlu0 %377 }
  0xb3   : > { %v324_v62 = vpop.xlane.xlu1 %323  ;;  %1885 = vmatprep.subr.mxu1 %v378_v61 }
  0xb4   : > { %1867 = vmatprep.subr.mxu0 %v324_v62  ;;  %1886 = vmatpush3.msra.mxu1 %v378_v61 }
  0xb5   : > { %1868 = vmatpush3.msra.mxu0 %v324_v62 }
  0xb6   : > { %1870 = vmatmul.mubr.msk.f32.vlgmr.msra.gmra.mxu0 %vm406_vm0, %v403_v63  ;;  %v375_v7 = vpop.xlane.xlu0 %374 }
  0xb7   : > { %1887 = vmatprep.subr.mxu1 %v375_v7  ;;  %1872 = vmatprep.mubr.msk.f32.mxu0 %vm406_vm0, %v404_v3  ;;  %v372_v10 = vpop.xlane.xlu1 %371 }
  0xb8   : > { %1888 = vmatpush3.msra.mxu1 %v375_v7 }
  0xb9   : > { %1889 = vmatprep.subr.mxu1 %v372_v10 }
  0xba   : > { %1873 = vmatmul.mubr.msk.f32.gmra.mxu0 %vm406_vm0, %v405_v11  ;;  %1890 = vmatpush3.msra.mxu1 %v372_v10 }
  0xbb   : > { %1892 = vmatmul.mubr.msk.f32.vlgmr.msra.gmra.mxu1 %vm406_vm0, %v403_v63  ;;  %1905 = vmatprep.mubr.msk.f32.mxu0 %vm613_vm1, %v605_v12 }
  0xbc   : > { %1894 = vmatprep.mubr.msk.f32.mxu1 %vm406_vm0, %v404_v3 }
  0xbf   : > { %1895 = vmatmul.mubr.msk.f32.gmra.mxu1 %vm406_vm0, %v405_v11  ;;  %v1011_v11 = vld [vmem:[%s2432_s4 + $0x8] sm:$0xff] }
  0xc0   : > { %1925 = vmatprep.mubr.msk.f32.mxu1 %vm613_vm1, %v605_v12 }
 0x176   : > { %v1871_v13 = vpop.f32.mrf.mxu0 }
 0x177   : > { %v590_v18 = vmul.f32 %v1871_v13, %v1871_v13 }
 0x178   : > { %v485_v14 = vpop.f32.mrf.mxu0 }
 0x179   : > { %v589_v25 = vmul.f32 %v485_v14, %v485_v14 }
 0x17a   : > { %v1874_v15 = vpop.f32.mrf.mxu0 }
 0x17b   : > { %1897 = vmatprep.subr.mxu0 %v1874_v15  ;;  %v1893_v16 = vpop.f32.mrf.mxu1  ;;  %v592_v19 = vmul.f32 %v1874_v15, %v1874_v15 }
 0x17c   : > { %v495_v17 = vpop.f32.mrf.mxu0  ;;  %1898 = vmatpush3.msra.mxu0 %v1874_v15  ;;  %v594_v24 = vsub.f32 %v1893_v16, %v590_v18  ;;  %v1015_v15 = vld [vmem:[%s2432_s4 + $0x28] sm:$0xff]  ;;  %v1017_v16 = vld [vmem:[%s2432_s4 + $0x38] sm:$0xff] }
 0x17d   : > { %1899 = vmatprep.subr.mxu0 %v495_v17  ;;  %v570_v22 = vpop.f32.mrf.mxu1  ;;  %v591_v29 = vmul.f32 %v495_v17, %v495_v17  ;;  %v1021_v18 = vld [vmem:[%s2432_s4 + $0x58] sm:$0xff] }
 0x17e   : > { %1900 = vmatpush3.msra.mxu0 %v495_v17  ;;  %v593_v35 = vsub.f32 %v570_v22, %v589_v25  ;;  %v598_v40 = vadd.f32 1e-06, %v594_v24  ;;  %v1019_v17 = vld [vmem:[%s2432_s4 + $0x48] sm:$0xff]  ;;  %v1025_v24 = vld [vmem:[%s2432_s4 + $0x78] sm:$0xff]  ;;  %v1014_v25 = vld [vmem:[%s2432_s4 + $0x20] sm:$0xff] }
 0x17f   : > { %1901 = vmatprep.subr.mxu0 %v1871_v13  ;;  %v1896_v23 = vpop.f32.mrf.mxu1  ;;  %v1023_v22 = vld [vmem:[%s2432_s4 + $0x68] sm:$0xff] }
 0x180   : > { %v596_v28 = vsub.f32 %v1896_v23, %v592_v19  ;;  %1902 = vmatpush3.msra.mxu0 %v1871_v13  ;;  %v597_v44 = vadd.f32 1e-06, %v593_v35  ;;  %v1013_v13 = vld [vmem:[%s2432_s4 + $0x18] sm:$0xff]  ;;  %v1010_v19 = vld [vmem:[%s2432_s4] sm:$0xff]  ;;  %v1012_v23 = vld [vmem:[%s2432_s4 + $0x10] sm:$0xff] }
 0x181   : > { %1903 = vmatprep.subr.mxu0 %v485_v14  ;;  %v580_v31 = vpop.f32.mrf.mxu1  ;;  %v1020_v35 = vld [vmem:[%s2432_s4 + $0x50] sm:$0xff] }
 0x182   : > { %v600_v36 = vadd.f32 1e-06, %v596_v28  ;;  %v595_v37 = vsub.f32 %v580_v31, %v591_v29  ;;  %1904 = vmatpush3.msra.mxu0 %v485_v14  ;;  %v1027_v28 = vld [vmem:[%s2432_s4 + $0x88] sm:$0xff]  ;;  %v1016_v29 = vld [vmem:[%s2432_s4 + $0x30] sm:$0xff]  ;;  %v1018_v31 = vld [vmem:[%s2432_s4 + $0x40] sm:$0xff] }
 0x183   : > { %1906 = vmatmul.mubr.msk.f32.vlgmr.msra.gmra.mxu0 %vm613_vm1, %v606_v30 }
 0x184   : > { %1970 = vrsqrt.f32 %v600_v36  ;;  %v599_v41 = vadd.f32 1e-06, %v595_v37  ;;  %1908 = vmatprep.mubr.msk.f32.mxu0 %vm613_vm1, %v607_v34  ;;  %v1033_v36 = vld [vmem:[%s2432_s4 + $0xb8] sm:$0xff]  ;;  %v1022_v37 = vld [vmem:[%s2432_s4 + $0x60] sm:$0xff] }
 0x186   : > { %1972 = vrsqrt.f32 %v599_v41  ;;  %v1026_v41 = vld [vmem:[%s2432_s4 + $0x80] sm:$0xff] }
 0x187   : > { %1909 = vmatmul.mubr.msk.f32.gmra.mxu0 %vm613_vm1, %v608_v42  ;;  %1974 = vrsqrt.f32 %v598_v40  ;;  %v1024_v40 = vld [vmem:[%s2432_s4 + $0x70] sm:$0xff] }
 0x188   : > { %1911 = vmatprep.mubr.msk.f32.mxu0 %vm613_vm1, %v609_v43  ;;  %1976 = vrsqrt.f32 %v597_v44  ;;  %v1032_v44 = vld [vmem:[%s2432_s4 + $0xb0] sm:$0xff] }
 0x18b   : > { %1912 = vmatmul.mubr.msk.f32.gmra.mxu0 %vm613_vm1, %v610_v45 }
 0x18c   : > { %1914 = vmatprep.mubr.msk.f32.mxu0 %vm613_vm1, %v611_v46 }
 0x18f   : > { %1915 = vmatmul.mubr.msk.f32.gmra.mxu0 %vm613_vm1, %v612_v47 }
 0x190   : > { %1282 = vmatprep.mubr.bf16.mxu0 %v1986_v52 }
 0x191   : > { %v1971_v48 = vpop.eup %1970 }
 0x192   : > { %1917 = vmatprep.subr.mxu1 %v1971_v48 }
 0x193   : > { %v1973_v49 = vpop.eup %1972  ;;  %1918 = vmatpush3.msra.mxu1 %v1971_v48 }
 0x194   : > { %1919 = vmatprep.subr.mxu1 %v1973_v49  ;;  %v1975_v50 = vpop.eup %1974 }
 0x195   : > { %1920 = vmatpush3.msra.mxu1 %v1973_v49  ;;  %v1977_v51 = vpop.eup %1976 }
 0x196   : > { %1921 = vmatprep.subr.mxu1 %v1975_v50 }
 0x197   : > { %1922 = vmatpush3.msra.mxu1 %v1975_v50 }
 0x198   : > { %1923 = vmatprep.subr.mxu1 %v1977_v51 }
 0x199   : > { %1924 = vmatpush3.msra.mxu1 %v1977_v51 }
 0x19a   : > { %1926 = vmatmul.mubr.msk.f32.vlgmr.msra.gmra.mxu1 %vm613_vm1, %v606_v30  ;;  %v1029_v30 = vld [vmem:[%s2432_s4 + $0x98] sm:$0xff] }
 0x19b   : > { %1928 = vmatprep.mubr.msk.f32.mxu1 %vm613_vm1, %v607_v34  ;;  %v1031_v34 = vld [vmem:[%s2432_s4 + $0xa8] sm:$0xff] }
 0x19e   : > { %1929 = vmatmul.mubr.msk.f32.gmra.mxu1 %vm613_vm1, %v608_v42  ;;  %v1028_v42 = vld [vmem:[%s2432_s4 + $0x90] sm:$0xff] }
 0x19f   : > { %1931 = vmatprep.mubr.msk.f32.mxu1 %vm613_vm1, %v609_v43  ;;  %v1030_v43 = vld [vmem:[%s2432_s4 + $0xa0] sm:$0xff] }
 0x1a2   : > { %1932 = vmatmul.mubr.msk.f32.gmra.mxu1 %vm613_vm1, %v610_v45 }
 0x1a3   : > { %1934 = vmatprep.mubr.msk.f32.mxu1 %vm613_vm1, %v611_v46 }
 0x1a6   : > { %1935 = vmatmul.mubr.msk.f32.gmra.mxu1 %vm613_vm1, %v612_v47 }
 0x1a7   : > { %1342 = vmatprep.mubr.bf16.mxu1 %v1986_v52 }
 0x243   : > { %v1907_v53 = vpop.f32.mrf.mxu0 }
 0x245   : > { %v704_v54 = vpop.f32.mrf.mxu0 }
 0x247   : > { %v1910_v55 = vpop.f32.mrf.mxu0 }
 0x249   : > { %v714_v56 = vpop.f32.mrf.mxu0 }
 0x24a   : > { %878 = vperm.xlu1 %1956, %v714_v56  }
 0x24b   : > { %v1913_v57 = vpop.f32.mrf.mxu0 }
 0x24d   : > { %v724_v58 = vpop.f32.mrf.mxu0 }
 0x24e   : > { %893 = vperm.xlu1 %1956, %v1913_v57  }
 0x24f   : > { %v1916_v59 = vpop.f32.mrf.mxu0 }
 0x251   : > { %v734_v60 = vpop.f32.mrf.mxu0 }
 0x252   : > { %888 = vperm.xlu1 %1956, %v724_v58   ;;  %898 = vperm.xlu0 %1957, %v734_v60  }
 0x256   : > { %903 = vperm.xlu1 %1956, %v1916_v59   ;;  %883 = vperm.xlu0 %1957, %v1910_v55  }
 0x25a   : > { %v1927_v61 = vpop.f32.mrf.mxu1 }
 0x25c   : > { %v809_v62 = vpop.f32.mrf.mxu1 }
 0x25e   : > { %v1930_v63 = vpop.f32.mrf.mxu1 }
 0x25f   : > { %939 = vperm.xlu0 %1957, %v1930_v63  }
 0x260   : > { %v819_v3 = vpop.f32.mrf.mxu1 }
 0x262   : > { %v1933_v7 = vpop.f32.mrf.mxu1 }
 0x263   : > { %873 = vperm.xlu0 %1957, %v1907_v53   ;;  %949 = vperm.xlu1 %1956, %v1933_v7  }
 0x264   : > { %v829_v10 = vpop.f32.mrf.mxu1 }
 0x266   : > { %v1936_v12 = vpop.f32.mrf.mxu1 }
 0x267   : > { %929 = vperm.xlu0 %1957, %v1927_v61   ;;  %944 = vperm.xlu1 %1956, %v829_v10  }
 0x268   : > { %v839_v14 = vpop.f32.mrf.mxu1 }
 0x26b   : > { %1041 = vperm.xlu0 %1957, %v1011_v11   ;;  %959 = vperm.xlu1 %1956, %v1936_v12  }
 0x26f   : > { %1051 = vperm.xlu0 %1957, %v1013_v13   ;;  %954 = vperm.xlu1 %1956, %v839_v14  }
 0x273   : > { %1061 = vperm.xlu0 %1957, %v1015_v15   ;;  %934 = vperm.xlu1 %1956, %v819_v3  }
 0x277   : > { %1071 = vperm.xlu0 %1957, %v1017_v16   ;;  %868 = vperm.xlu1 %1956, %v704_v54  }
 0x27b   : > { %1081 = vperm.xlu0 %1957, %v1019_v17   ;;  %924 = vperm.xlu1 %1956, %v809_v62  }
 0x27f   : > { %1091 = vperm.xlu0 %1957, %v1021_v18   ;;  %1036 = vperm.xlu1 %1956, %v1010_v19  }
 0x283   : > { %1101 = vperm.xlu0 %1957, %v1023_v22   ;;  %1046 = vperm.xlu1 %1956, %v1012_v23  }
 0x287   : > { %1111 = vperm.xlu0 %1957, %v1025_v24   ;;  %1056 = vperm.xlu1 %1956, %v1014_v25  }
 0x28b   : > { %1121 = vperm.xlu0 %1957, %v1027_v28   ;;  %1066 = vperm.xlu1 %1956, %v1016_v29  }
 0x28f   : > { %1131 = vperm.xlu0 %1957, %v1029_v30   ;;  %1076 = vperm.xlu1 %1956, %v1018_v31  }
 0x293   : > { %1141 = vperm.xlu0 %1957, %v1031_v34   ;;  %1086 = vperm.xlu1 %1956, %v1020_v35  }
 0x297   : > { %1151 = vperm.xlu0 %1957, %v1033_v36   ;;  %1096 = vperm.xlu1 %1956, %v1022_v37  }
 0x29b   : > { %1106 = vperm.xlu1 %1956, %v1024_v40  }
 0x29f   : > { %1116 = vperm.xlu1 %1956, %v1026_v41   ;;  %v1961_v41 = vld [vmem:[%s2431_s3 + $0x38] sm:$0xff]  }
 0x2a3   : > { %1126 = vperm.xlu1 %1956, %v1028_v42   ;;  %v1962_v42 = vld [vmem:[%s2431_s3 + $0x10] sm:$0xff]  }
 0x2a7   : > { %1136 = vperm.xlu1 %1956, %v1030_v43   ;;  %v1963_v43 = vld [vmem:[%s2431_s3 + $0x40] sm:$0xff]  }
 0x2ab   : > { %1146 = vperm.xlu1 %1956, %v1032_v44   ;;  %v1964_v44 = vld [vmem:[%s2431_s3 + $0x18] sm:$0xff]  }
 0x2c5   : > { %v879_v45 = vpop.permute.xlu1 %878 }
 0x2c6   : > { %v910_v18 = vsub.f32 %v2101_v26, %v879_v45 }
 0x2c9   : > { %v894_v46 = vpop.permute.xlu1 %893 }
 0x2ca   : > { %v917_v61 = vsub.f32 %v2056_v4, %v894_v46 }
 0x2cd   : > { %v889_v47 = vpop.permute.xlu1 %888  ;;  %v899_v49 = vpop.permute.xlu0 %898 }
 0x2ce   : > { %v915_v55 = vsub.f32 %v2070_v9, %v889_v47  ;;  %v918_v57 = vsub.f32 %v2059_v5, %v899_v49  ;;  %v919_v58 = vsub.f32 %v2062_v6, %v899_v49  ;;  %v914_v12 = vsub.f32 %v2067_v8, %v889_v47  ;;  %v1967_v47 = vld [vmem:[%s2431_s3 + $0x50] sm:$0xff]   ;;  %v1969_v49 = vld [vmem:[%s2431_s3 + $0x58] sm:$0xff]  }
 0x2cf   : > { %v911_v9 = vsub.f32 %v2104_v27, %v879_v45  ;;  %v916_v6 = vsub.f32 %v2051_v2, %v894_v46  ;;  %v1965_v45 = vld [vmem:[%s2431_s3 + $0x48] sm:$0xff]   ;;  %v1966_v46 = vld [vmem:[%s2431_s3 + $0x20] sm:$0xff]  }
 0x2d1   : > { %v904_v48 = vpop.permute.xlu1 %903  ;;  %v884_v53 = vpop.permute.xlu0 %883 }
 0x2d2   : > { %v920_v59 = vsub.f32 %v2045_v0, %v904_v48  ;;  %v921_v60 = vsub.f32 %v2048_v1, %v904_v48  ;;  %v913_v4 = vsub.f32 %v2092_v21, %v884_v53  ;;  %v912_v27 = vsub.f32 %v2089_v20, %v884_v53  ;;  %v1968_v48 = vld [vmem:[%s2431_s3 + $0x28] sm:$0xff]  }
 0x2da   : > { %v940_v56 = vpop.permute.xlu0 %939 }
 0x2db   : > { %v969_v8 = vmul.f32 %v940_v56, %v913_v4  ;;  %v968_v25 = vmul.f32 %v940_v56, %v912_v27 }
 0x2de   : > { %v950_v50 = vpop.permute.xlu1 %949  ;;  %v874_v0 = vpop.permute.xlu0 %873 }
 0x2df   : > { %v973_v13 = vmul.f32 %v950_v50, %v917_v61  ;;  %v972_v19 = vmul.f32 %v950_v50, %v916_v6  ;;  %v908_v21 = vsub.f32 %v2113_v32, %v874_v0  ;;  %v909_v26 = vsub.f32 %v2116_v33, %v874_v0  ;;  %v1958_v33 = vld [vmem:[%s2431_s3] sm:$0xff]  }
 0x2e2   : > { %v945_v51 = vpop.permute.xlu1 %944  ;;  %v930_v28 = vpop.permute.xlu0 %929 }
 0x2e3   : > { %v971_v62 = vmul.f32 %v945_v51, %v915_v55  ;;  %v970_v15 = vmul.f32 %v945_v51, %v914_v12  ;;  %v964_v34 = vmul.f32 %v930_v28, %v908_v21  ;;  %v965_v35 = vmul.f32 %v930_v28, %v909_v26 }
 0x2e5   : > { %v983_v16 = vpack.c.bf16 %v973_v13, %v971_v62  ;;  %v982_v2 = vpack.c.bf16 %v972_v19, %v970_v15 }
 0x2e6   : > { %v960_v54 = vpop.permute.xlu1 %959  ;;  %v1042_v51 = vpop.permute.xlu0 %1041 }
 0x2e7   : > { %v976_v3 = vmul.f32 %v960_v54, %v920_v59  ;;  %v977_v7 = vmul.f32 %v960_v54, %v921_v60 }
 0x2ea   : > { %v955_v63 = vpop.permute.xlu1 %954  ;;  %v1052_v54 = vpop.permute.xlu0 %1051 }
 0x2eb   : > { %v974_v10 = vmul.f32 %v955_v63, %v918_v57  ;;  %v975_v11 = vmul.f32 %v955_v63, %v919_v58 }
 0x2ed   : > { %v984_v5 = vpack.c.bf16 %v976_v3, %v974_v10  ;;  %v985_v14 = vpack.c.bf16 %v977_v7, %v975_v11 }
 0x2ee   : > { %v935_v1 = vpop.permute.xlu1 %934  ;;  %v2360_v56 = vpop.permute.xlu0 %1061 }
 0x2ef   : > { %v967_v17 = vmul.f32 %v935_v1, %v911_v9  ;;  %1258 = vmatprep.subr.bf16.mxu0 %v985_v14  ;;  %1937 = vmatprep.subr.bf16.mxu1 %v985_v14  ;;  %v966_v22 = vmul.f32 %v935_v1, %v910_v18 }
 0x2f0   : > { %1259 = vmatpush1.bf16.msra.mxu0 %v984_v5  ;;  %1941 = vmatpush1.bf16.msra.mxu1 %v984_v5 }
 0x2f1   : > { %1260 = vmatprep.subr.bf16.mxu0 %v983_v16  ;;  %1938 = vmatprep.subr.bf16.mxu1 %v983_v16  ;;  %v981_v24 = vpack.c.bf16 %v969_v8, %v967_v17  ;;  %v980_v31 = vpack.c.bf16 %v968_v25, %v966_v22 }
 0x2f2   : > { %v869_v23 = vpop.permute.xlu1 %868  ;;  %v2364_v58 = vpop.permute.xlu0 %1071 }
 0x2f3   : > { %v906_v29 = vsub.f32 %v2125_v38, %v869_v23  ;;  %v907_v30 = vsub.f32 %v2128_v39, %v869_v23  ;;  %v1959_v38 = vld [vmem:[%s2431_s3 + $0x30] sm:$0xff]   ;;  %v1960_v39 = vld [vmem:[%s2431_s3 + $0x8] sm:$0xff]  }
 0x2f4   : > { %1261 = vmatpush1.bf16.msra.mxu0 %v982_v2  ;;  %1942 = vmatpush1.bf16.msra.mxu1 %v982_v2 }
 0x2f5   : > { %1262 = vmatprep.subr.bf16.mxu0 %v981_v24  ;;  %1939 = vmatprep.subr.bf16.mxu1 %v981_v24 }
 0x2f6   : > { %v925_v20 = vpop.permute.xlu1 %924  ;;  %v2368_v60 = vpop.permute.xlu0 %1081 }
 0x2f7   : > { %v962_v36 = vmul.f32 %v925_v20, %v906_v29  ;;  %v963_v37 = vmul.f32 %v925_v20, %v907_v30 }
 0x2f8   : > { %1263 = vmatpush1.bf16.msra.mxu0 %v980_v31  ;;  %1943 = vmatpush1.bf16.msra.mxu1 %v980_v31 }
 0x2f9   : > { %v978_v32 = vpack.c.bf16 %v964_v34, %v962_v36  ;;  %v979_v40 = vpack.c.bf16 %v965_v35, %v963_v37 }
 0x2fa   : > { %v1037_v50 = vpop.permute.xlu1 %1036  ;;  %v2372_v62 = vpop.permute.xlu0 %1091 }
 0x2fb   : > { %1264 = vmatprep.subr.bf16.mxu0 %v979_v40  ;;  %1940 = vmatprep.subr.bf16.mxu1 %v979_v40 }
 0x2fc   : > { %1265 = vmatpush1.bf16.msra.mxu0 %v978_v32  ;;  %1944 = vmatpush1.bf16.msra.mxu1 %v978_v32 }
 0x2fe   : > { %v1047_v53 = vpop.permute.xlu1 %1046  ;;  %v1102_v0 = vpop.permute.xlu0 %1101 }
 0x2ff   : > { %1740 = vmatmul.mubr.msk.bf16.vlgmr.msra.gmra.mxu0 %vm406_vm0, %v1958_v33  ;;  %1746 = vmatmul.mubr.msk.bf16.vlgmr.msra.gmra.mxu1 %vm406_vm0, %v1959_v38 }
 0x300   : > { %1292 = vmatprep.mubr.bf16.mxu0 %v1986_v52  ;;  %1352 = vmatprep.mubr.bf16.mxu1 %v1986_v52 }
 0x302   : > { %v2358_v55 = vpop.permute.xlu1 %1056  ;;  %v1112_v34 = vpop.permute.xlu0 %1111 }
 0x306   : > { %v2362_v57 = vpop.permute.xlu1 %1066 }
 0x307   : > { %1741 = vmatmul.mubr.msk.bf16.gmra.mxu0 %vm406_vm0, %v1960_v39  ;;  %1747 = vmatmul.mubr.msk.bf16.gmra.mxu1 %vm406_vm0, %v1961_v41 }
 0x308   : > { %1302 = vmatprep.mubr.bf16.mxu0 %v1986_v52  ;;  %1362 = vmatprep.mubr.bf16.mxu1 %v1986_v52 }
 0x30a   : > { %v2366_v59 = vpop.permute.xlu1 %1076 }
 0x30e   : > { %v2370_v61 = vpop.permute.xlu1 %1086 }
 0x30f   : > { %1742 = vmatmul.mubr.msk.bf16.gmra.mxu0 %vm406_vm0, %v1962_v42  ;;  %1748 = vmatmul.mubr.msk.bf16.gmra.mxu1 %vm406_vm0, %v1963_v43 }
 0x310   : > { %1312 = vmatprep.mubr.bf16.mxu0 %v1986_v52  ;;  %1372 = vmatprep.mubr.bf16.mxu1 %v1986_v52 }
 0x312   : > { %v1097_v7 = vpop.permute.xlu1 %1096 }
 0x316   : > { %v1107_v22 = vpop.permute.xlu1 %1106 }
 0x317   : > { %1743 = vmatmul.mubr.msk.bf16.gmra.mxu0 %vm406_vm0, %v1964_v44  ;;  %1749 = vmatmul.mubr.msk.bf16.gmra.mxu1 %vm406_vm0, %v1965_v45 }
 0x318   : > { %1322 = vmatprep.mubr.bf16.mxu0 %v1986_v52  ;;  %1382 = vmatprep.mubr.bf16.mxu1 %v1986_v52 }
 0x31a   : > { %v1117_v43 = vpop.permute.xlu1 %1116 }
 0x31f   : > { %1744 = vmatmul.mubr.msk.bf16.gmra.mxu0 %vm406_vm0, %v1966_v46  ;;  %1750 = vmatmul.mubr.msk.bf16.gmra.mxu1 %vm406_vm0, %v1967_v47 }
 0x320   : > { %1332 = vmatprep.mubr.bf16.mxu0 %v1986_v52  ;;  %1392 = vmatprep.mubr.bf16.mxu1 %v1986_v52  ;;  %v1987_v52 = vmov 1065369472  }
 0x321   : > { %848 = vst [vmem:[%s2354_s22 + $0x40] sm:$0xff] %v1987_v52  ;;  %849 = vst [vmem:[%s2354_s22 + $0x48] sm:$0xff] %v1987_v52 }
 0x327   : > { %1745 = vmatmul.mubr.msk.bf16.gmra.mxu0 %vm406_vm0, %v1968_v48  ;;  %1751 = vmatmul.mubr.msk.bf16.gmra.mxu1 %vm406_vm0, %v1969_v49 }
 0x3bf   : > { %v1284_v63 = vpop.f32.mrf.mxu0  ;;  %v1344_v3 = vpop.f32.mrf.mxu1 }
 0x3c0   : > { %v1285_v12 = vadd.f32 %v1284_v63, %v1037_v50  ;;  %v1345_v9 = vadd.f32 %v1344_v3, %v1097_v7 }
 0x3c1   : > { %v1286_v10 = vpop.f32.mrf.mxu0  ;;  %v1346_v11 = vpop.f32.mrf.mxu1 }
 0x3c2   : > { %v1287_v13 = vadd.f32 %v1286_v10, %v1037_v50  ;;  %v1347_v5 = vadd.f32 %v1346_v11, %v1097_v7 }
 0x3c3   : > { %v1288_v14 = vpop.f32.mrf.mxu0  ;;  %v1348_v6 = vpop.f32.mrf.mxu1 }
 0x3c4   : > { %v1781_v15 = vpack.c.bf16 %v1287_v13, %v1285_v12  ;;  %v1793_v1 = vpack.c.bf16 %v1347_v5, %v1345_v9  ;;  %v1289_v17 = vadd.f32 %v1288_v14, %v1042_v51  ;;  %v1349_v18 = vadd.f32 %v1348_v6, %v1102_v0  ;;  %v1127_v14 = vpop.permute.xlu1 %1126 }
 0x3c5   : > { %v1290_v4 = vpop.f32.mrf.mxu0  ;;  %v1350_v16 = vpop.f32.mrf.mxu1 }
 0x3c6   : > { %1451 = vst [vmem:[%s2378_s28] sm:$0xff] %v1781_v15  ;;  %1511 = vst [vmem:[%s2383_s8 + $0x20] sm:$0xff] %v1793_v1  ;;  %v1291_v19 = vadd.f32 %v1290_v4, %v1042_v51  ;;  %v1351_v8 = vadd.f32 %v1350_v16, %v1102_v0 }
 0x3c7   : > { %v1294_v27 = vpop.f32.mrf.mxu0  ;;  %v1354_v2 = vpop.f32.mrf.mxu1 }
 0x3c8   : > { %v1782_v23 = vpack.c.bf16 %v1291_v19, %v1289_v17  ;;  %v1794_v24 = vpack.c.bf16 %v1351_v8, %v1349_v18  ;;  %v1295_v28 = vadd.f32 %v1294_v27, %v1047_v53  ;;  %v1355_v26 = vadd.f32 %v1354_v2, %v1107_v22 }
 0x3c9   : > { %v1296_v25 = vpop.f32.mrf.mxu0  ;;  %v1356_v21 = vpop.f32.mrf.mxu1 }
 0x3ca   : > { %1452 = vst [vmem:[%s2378_s28 + $0x8] sm:$0xff] %v1782_v23  ;;  %1512 = vst [vmem:[%s2383_s8 + $0x28] sm:$0xff] %v1794_v24  ;;  %v1297_v29 = vadd.f32 %v1296_v25, %v1047_v53  ;;  %v1357_v30 = vadd.f32 %v1356_v21, %v1107_v22 }
 0x3cb   : > { %v1298_v31 = vpop.f32.mrf.mxu0  ;;  %v1358_v20 = vpop.f32.mrf.mxu1 }
 0x3cc   : > { %v1783_v35 = vpack.c.bf16 %v1297_v29, %v1295_v28  ;;  %v1795_v36 = vpack.c.bf16 %v1357_v30, %v1355_v26  ;;  %v1299_v40 = vadd.f32 %v1298_v31, %v1052_v54  ;;  %v1359_v33 = vadd.f32 %v1358_v20, %v1112_v34  ;;  %v1137_v29 = vpop.permute.xlu1 %1136 }
 0x3cd   : > { %v1300_v37 = vpop.f32.mrf.mxu0  ;;  %v1360_v32 = vpop.f32.mrf.mxu1 }
 0x3ce   : > { %1453 = vst [vmem:[%s2378_s28 + $0x10] sm:$0xff] %v1783_v35  ;;  %1513 = vst [vmem:[%s2383_s8 + $0x30] sm:$0xff] %v1795_v36  ;;  %v1301_v38 = vadd.f32 %v1300_v37, %v1052_v54  ;;  %v1361_v39 = vadd.f32 %v1360_v32, %v1112_v34  ;;  %v1122_v54 = vpop.permute.xlu0 %1121 }
 0x3cf   : > { %v1304_v41 = vpop.f32.mrf.mxu0  ;;  %v1364_v42 = vpop.f32.mrf.mxu1 }
 0x3d0   : > { %v1784_v44 = vpack.c.bf16 %v1301_v38, %v1299_v40  ;;  %v1796_v45 = vpack.c.bf16 %v1361_v39, %v1359_v33  ;;  %v1305_v48 = vadd.f32 %v1304_v41, %v2358_v55  ;;  %v1365_v49 = vadd.f32 %v1364_v42, %v1117_v43 }
 0x3d1   : > { %v1306_v46 = vpop.f32.mrf.mxu0  ;;  %v1366_v47 = vpop.f32.mrf.mxu1 }
 0x3d2   : > { %1454 = vst [vmem:[%s2378_s28 + $0x18] sm:$0xff] %v1784_v44  ;;  %1514 = vst [vmem:[%s2383_s8 + $0x38] sm:$0xff] %v1796_v45  ;;  %v1307_v52 = vadd.f32 %v1306_v46, %v2358_v55  ;;  %v1367_v50 = vadd.f32 %v1366_v47, %v1117_v43  ;;  %v1132_v8 = vpop.permute.xlu0 %1131 }
 0x3d3   : > { %v1308_v51 = vpop.f32.mrf.mxu0  ;;  %v1368_v53 = vpop.f32.mrf.mxu1 }
 0x3d4   : > { %v1785_v63 = vpack.c.bf16 %v1307_v52, %v1305_v48  ;;  %v1797_v3 = vpack.c.bf16 %v1367_v50, %v1365_v49  ;;  %v1309_v11 = vadd.f32 %v1308_v51, %v2360_v56  ;;  %v1369_v12 = vadd.f32 %v1368_v53, %v1122_v54  ;;  %v1147_v48 = vpop.permute.xlu1 %1146 }
 0x3d5   : > { %v1310_v7 = vpop.f32.mrf.mxu0  ;;  %v1370_v10 = vpop.f32.mrf.mxu1 }
 0x3d6   : > { %1455 = vst [vmem:[%s2378_s28 + $0x20] sm:$0xff] %v1785_v63  ;;  %1563 = vst [vmem:[%s2354_s22] sm:$0xff] %v1797_v3  ;;  %v1311_v9 = vadd.f32 %v1310_v7, %v2360_v56  ;;  %v1371_v13 = vadd.f32 %v1370_v10, %v1122_v54  ;;  %v1142_v33 = vpop.permute.xlu0 %1141 }
 0x3d7   : > { %v1314_v5 = vpop.f32.mrf.mxu0  ;;  %v1374_v55 = vpop.f32.mrf.mxu1 }
 0x3d8   : > { %v1786_v6 = vpack.c.bf16 %v1311_v9, %v1309_v11  ;;  %v1798_v0 = vpack.c.bf16 %v1371_v13, %v1369_v12  ;;  %v1315_v4 = vadd.f32 %v1314_v5, %v2362_v57  ;;  %v1375_v16 = vadd.f32 %v1374_v55, %v1127_v14 }
 0x3d9   : > { %v1316_v15 = vpop.f32.mrf.mxu0  ;;  %v1376_v1 = vpop.f32.mrf.mxu1 }
 0x3da   : > { %1456 = vst [vmem:[%s2378_s28 + $0x28] sm:$0xff] %v1786_v6  ;;  %1564 = vst [vmem:[%s2354_s22 + $0x8] sm:$0xff] %v1798_v0  ;;  %v1317_v17 = vadd.f32 %v1316_v15, %v2362_v57  ;;  %v1377_v18 = vadd.f32 %v1376_v1, %v1127_v14  ;;  %v1152_v10 = vpop.permute.xlu0 %1151 }
 0x3db   : > { %v1318_v19 = vpop.f32.mrf.mxu0  ;;  %v1378_v56 = vpop.f32.mrf.mxu1 }
 0x3dc   : > { %v1787_v27 = vpack.c.bf16 %v1317_v17, %v1315_v4  ;;  %v1799_v2 = vpack.c.bf16 %v1377_v18, %v1375_v16  ;;  %v1319_v24 = vadd.f32 %v1318_v19, %v2364_v58  ;;  %v1379_v25 = vadd.f32 %v1378_v56, %v1132_v8 }
 0x3dd   : > { %v1320_v22 = vpop.f32.mrf.mxu0  ;;  %v1380_v23 = vpop.f32.mrf.mxu1 }
 0x3de   : > { %1457 = vst [vmem:[%s2378_s28 + $0x30] sm:$0xff] %v1787_v27  ;;  %1565 = vst [vmem:[%s2354_s22 + $0x10] sm:$0xff] %v1799_v2  ;;  %v1321_v21 = vadd.f32 %v1320_v22, %v2364_v58  ;;  %v1381_v28 = vadd.f32 %v1380_v23, %v1132_v8 }
 0x3df   : > { %v1324_v26 = vpop.f32.mrf.mxu0  ;;  %v1384_v57 = vpop.f32.mrf.mxu1 }
 0x3e0   : > { %v1788_v30 = vpack.c.bf16 %v1321_v21, %v1319_v24  ;;  %v1800_v31 = vpack.c.bf16 %v1381_v28, %v1379_v25  ;;  %v1325_v35 = vadd.f32 %v1324_v26, %v2366_v59  ;;  %v1385_v36 = vadd.f32 %v1384_v57, %v1137_v29 }
 0x3e1   : > { %v1326_v20 = vpop.f32.mrf.mxu0  ;;  %v1386_v34 = vpop.f32.mrf.mxu1 }
 0x3e2   : > { %1458 = vst [vmem:[%s2378_s28 + $0x38] sm:$0xff] %v1788_v30  ;;  %1566 = vst [vmem:[%s2354_s22 + $0x18] sm:$0xff] %v1800_v31  ;;  %v1327_v37 = vadd.f32 %v1326_v20, %v2366_v59  ;;  %v1387_v32 = vadd.f32 %v1386_v34, %v1137_v29 }
 0x3e3   : > { %v1328_v40 = vpop.f32.mrf.mxu0  ;;  %v1388_v58 = vpop.f32.mrf.mxu1 }
 0x3e4   : > { %v1789_v38 = vpack.c.bf16 %v1327_v37, %v1325_v35  ;;  %v1801_v39 = vpack.c.bf16 %v1387_v32, %v1385_v36  ;;  %v1329_v43 = vadd.f32 %v1328_v40, %v2368_v60  ;;  %v1389_v44 = vadd.f32 %v1388_v58, %v1142_v33 }
 0x3e5   : > { %v1330_v41 = vpop.f32.mrf.mxu0  ;;  %v1390_v42 = vpop.f32.mrf.mxu1 }
 0x3e6   : > { %1507 = vst [vmem:[%s2383_s8] sm:$0xff] %v1789_v38  ;;  %1567 = vst [vmem:[%s2354_s22 + $0x20] sm:$0xff] %v1801_v39  ;;  %v1331_v45 = vadd.f32 %v1330_v41, %v2368_v60  ;;  %v1391_v46 = vadd.f32 %v1390_v42, %v1142_v33 }
 0x3e7   : > { %v1334_v47 = vpop.f32.mrf.mxu0  ;;  %v1394_v59 = vpop.f32.mrf.mxu1 }
 0x3e8   : > { %v1790_v49 = vpack.c.bf16 %v1331_v45, %v1329_v43  ;;  %v1802_v52 = vpack.c.bf16 %v1391_v46, %v1389_v44  ;;  %v1335_v53 = vadd.f32 %v1334_v47, %v2370_v61  ;;  %v1395_v54 = vadd.f32 %v1394_v59, %v1147_v48 }
 0x3e9   : > { %v1336_v50 = vpop.f32.mrf.mxu0  ;;  %v1396_v51 = vpop.f32.mrf.mxu1 }
 0x3ea   : > { %1508 = vst [vmem:[%s2383_s8 + $0x8] sm:$0xff] %v1790_v49  ;;  %1568 = vst [vmem:[%s2354_s22 + $0x28] sm:$0xff] %v1802_v52  ;;  %v1337_v63 = vadd.f32 %v1336_v50, %v2370_v61  ;;  %v1397_v3 = vadd.f32 %v1396_v51, %v1147_v48 }
 0x3eb   : > { %v1338_v60 = vpop.f32.mrf.mxu0  ;;  %v1398_v7 = vpop.f32.mrf.mxu1 }
 0x3ec   : > { %v1791_v11 = vpack.c.bf16 %v1337_v63, %v1335_v53  ;;  %v1803_v12 = vpack.c.bf16 %v1397_v3, %v1395_v54  ;;  %v1339_v5 = vadd.f32 %v1338_v60, %v2372_v62  ;;  %v1399_v55 = vadd.f32 %v1398_v7, %v1152_v10 }
 0x3ed   : > { %v1340_v9 = vpop.f32.mrf.mxu0  ;;  %v1400_v13 = vpop.f32.mrf.mxu1 }
 0x3ee   : > { %1509 = vst [vmem:[%s2383_s8 + $0x10] sm:$0xff] %v1791_v11  ;;  %1569 = vst [vmem:[%s2354_s22 + $0x30] sm:$0xff] %v1803_v12  ;;  %v1341_v14 = vadd.f32 %v1340_v9, %v2372_v62  ;;  %v1401_v6 = vadd.f32 %v1400_v13, %v1152_v10 }
 0x3f0   : > { %v1792_v0 = vpack.c.bf16 %v1341_v14, %v1339_v5  ;;  %v1804_v61 = vpack.c.bf16 %v1401_v6, %v1399_v55 }
 0x3f2   : > { %1510 = vst [vmem:[%s2383_s8 + $0x18] sm:$0xff] %v1792_v0  ;;  %1570 = vst [vmem:[%s2354_s22 + $0x38] sm:$0xff] %v1804_v61 }
 0x3f3 PF: > { %s18_s24 = sadd.s32 1, %s1984_s24  }
 0x3f4   : > { %p15_p4 = scmp.ge.s32.totalorder %s18_s24, 4  }
 0x3f6   :  { %17 = sbr.rel (!%p15_p4) target bundleno = 1 (0x1), region = 94 }

</bundles_post_ra>
